<compile_context>
chip_gen: v7x
topology: tpu7x:2x2x1
jax: 0.10.0
libtpu: 0.0.40
codegen_flags: <defaults>
</compile_context>

<pallas_src>
import functools

import jax
import jax.numpy as jnp
import numpy as np
from jax.experimental import pallas as pl
from jax.experimental.pallas import tpu as pltpu


def _round_up(x, m):
    return (x + m - 1) // m * m


# ---------------------------------------------------------------------------
# Fused kernel: tiled conv-as-matmul encoder + segmented mean pool (accumulated
# across the grid) + attention head + losses on the final grid step.
# ---------------------------------------------------------------------------
def fused_kernel(B, N, crop_off,
                 patches_ref, w_ref, b_ref, pool_ref,
                 wa_ref, wh1_ref, wh2_ref, bh_ref, label_ref,
                 out_ref, wmax_ref, worg_ref, loss_ref,
                 acc_ref):
    i = pl.program_id(0)

    @pl.when(i == 0)
    def _():
        acc_ref[...] = jnp.zeros_like(acc_ref)

    # Encoder tile: 3x3 conv as one (TM, K) @ (K, Fp) MXU matmul, bf16 in / f32 acc.
    y = jnp.dot(patches_ref[...], w_ref[...],
                preferred_element_type=jnp.float32)            # (TM, Fp)
    y = jnp.maximum(y + b_ref[...], 0.0)                       # bias + ReLU (f32, VPU)

    # Segmented global-average pooling as a matmul into the resident accumulator.
    acc_ref[...] += jnp.dot(pool_ref[...], y,
                            preferred_element_type=jnp.float32)  # (G_pad, Fp)

    @pl.when(i == pl.num_programs(0) - 1)
    def _():
        pooled = acc_ref[...]                                  # (G_pad, Fp)
        feat = pooled[:B, :]                                   # (B, Fp) main-image feats
        cf = pooled[crop_off:crop_off + B * N, :].reshape(B, N, -1)  # (B, N, Fp)

        # attention scores (padded lanes are zero -> identical to unpadded math)
        scores = jnp.sum(cf * wa_ref[...][None, :, :], axis=-1)     # (B, N)

        def _softmax(s):
            m = jnp.max(s, axis=-1, keepdims=True)
            e = jnp.exp(s - m)
            return e * pl.reciprocal(jnp.sum(e, axis=-1, keepdims=True),
                                     approx=True)

        worg = _softmax(scores)                                # weights_org
        wmax = _softmax(scores * 10.0)                         # weights_max (sharpened)

        agg = jnp.sum(worg[..., None] * cf, axis=1)            # (B, Fp)

        # linear head as lane reductions (avoid 1-column MXU matmuls)
        logits = (jnp.sum(feat * wh1_ref[...], axis=-1, keepdims=True)
                  + jnp.sum(agg * wh2_ref[...], axis=-1, keepdims=True)
                  + bh_ref[0, 0])                              # (B, 1) == output

        # criterion1: nn.CrossEntropyLoss(output.view(-1), label.float())
        # 1-D logits + float targets == -sum(target * log_softmax(logits))
        lab = label_ref[...]                                   # (B, 1)
        m = jnp.max(logits)
        lse = m + jnp.log(jnp.sum(jnp.exp(logits - m)))
        ce = -jnp.sum(lab * (logits - lse))

        # criterion: get_loss()(weights_max, weights_org)
        # TODO(synk): real get_loss() is not defined in the source repo; MSE stand-in.
        mse = jnp.mean((wmax - worg) ** 2)

        out_ref[...] = logits
        wmax_ref[...] = wmax
        worg_ref[...] = worg
        loss_ref[0, 0] = mse + ce


# ---------------------------------------------------------------------------
# Glue
# ---------------------------------------------------------------------------
def im2col(x_nchw, k=3, pad=1):
    """NCHW -> (B, H*W, C*k*k) patch matrix for a stride-1, padded kxk conv."""
    B, C, H, W = x_nchw.shape
    xp = jnp.pad(x_nchw, ((0, 0), (0, 0), (pad, pad), (pad, pad)))
    cols = []
    for di in range(k):
        for dj in range(k):
            cols.append(xp[:, :, di:di + H, dj:dj + W])
    p = jnp.stack(cols, axis=-1)                               # (B, C, H, W, k*k)
    p = p.transpose(0, 2, 3, 1, 4).reshape(B, H * W, C * k * k)
    return p.astype(jnp.float32)


class TrainerForward:
    """JAX/Pallas equivalent of Trainer.forward() (inference-side compute only)."""

    def __init__(self, key, in_ch=4, feat_dim=32, feat_pad=128):
        k1, k2, k3, k4 = jax.random.split(key, 4)
        K = in_ch * 9
        self.feat_dim = feat_dim
        self.feat_pad = feat_pad
        pad = feat_pad - feat_dim
        w = 0.1 * jax.random.normal(k1, (K, feat_dim), jnp.float32)
        # Feature dim zero-padded to 128 -> lane-dense; padded lanes stay exactly 0.
        self.w_conv = jnp.pad(w, ((0, 0), (0, pad))).astype(jnp.bfloat16)
        self.b_conv = jnp.zeros((1, feat_pad), jnp.float32)
        self.w_attn = jnp.pad(0.1 * jax.random.normal(k2, (1, feat_dim), jnp.float32),
                              ((0, 0), (0, pad)))
        self.wh1 = jnp.pad(0.1 * jax.random.normal(k3, (1, feat_dim), jnp.float32),
                           ((0, 0), (0, pad)))
        self.wh2 = jnp.pad(0.1 * jax.random.normal(k4, (1, feat_dim), jnp.float32),
                           ((0, 0), (0, pad)))
        self.bh = jnp.zeros((1, 1), jnp.float32)

    def forward(self, x, crops, label, *, tm=512):
        B, C, H, W = x.shape
        crop_list = [c for sub in crops for c in sub]
        N = len(crop_list)
        Hc, Wc = crop_list[0].shape[-2:]
        S_main, S_c = H * W, Hc * Wc
        K = C * 9
        Fp = self.feat_pad

        # im2col exactly twice: once for the main image, once for ALL crops stacked
        # batch-major (b, n) so pooled crop rows reshape straight to (B, N, F).
        p_main = im2col(x).reshape(B * S_main, K)
        crops_bn = jnp.stack(crop_list, axis=1).reshape(B * N, C, Hc, Wc)
        p_crops = im2col(crops_bn).reshape(B * N * S_c, K)
        patches = jnp.concatenate([p_main, p_crops], axis=0)   # (M, K)
        M = patches.shape[0]
        M_pad = _round_up(max(M, tm), tm)
        patches = jnp.pad(patches, ((0, M_pad - M), (0, 0))).astype(jnp.bfloat16)

        # Segmented mean-pooling matrix (rows 8-aligned so kernel slices are clean;
        # padded rows/columns are zero, so padded patch rows never contribute).
        crop_off = _round_up(B, 8)
        G_pad = crop_off + _round_up(B * N, 8)
        pool = np.zeros((G_pad, M_pad), np.float32)
        for b in range(B):
            pool[b, b * S_main:(b + 1) * S_main] = 1.0 / S_main
        base = B * S_main
        for j in range(B * N):
            pool[crop_off + j, base + j * S_c: base + (j + 1) * S_c] = 1.0 / S_c
        pool = jnp.asarray(pool)

        kernel = functools.partial(fused_kernel, B, N, crop_off)

        out, wmax, worg, loss = pl.pallas_call(
            kernel,
            out_shape=(
                jax.ShapeDtypeStruct((B, 1), jnp.float32),     # output
                jax.ShapeDtypeStruct((B, N), jnp.float32),     # weights_max
                jax.ShapeDtypeStruct((B, N), jnp.float32),     # weights_org
                jax.ShapeDtypeStruct((1, 1), jnp.float32),     # loss (scalar)
            ),
            grid=(M_pad // tm,),
            in_specs=[
                pl.BlockSpec((tm, K), lambda i: (i, 0)),           # patch rows tile
                pl.BlockSpec((K, Fp), lambda i: (0, 0)),           # conv weight (bf16)
                pl.BlockSpec((1, Fp), lambda i: (0, 0)),           # conv bias
                pl.BlockSpec((G_pad, tm), lambda i: (0, i)),       # pooling matrix tile
                pl.BlockSpec((1, Fp), lambda i: (0, 0)),           # attention weight
                pl.BlockSpec((1, Fp), lambda i: (0, 0)),           # head weight 1
                pl.BlockSpec((1, Fp), lambda i: (0, 0)),           # head weight 2
                pl.BlockSpec(memory_space=pltpu.MemorySpace.SMEM), # head bias (scalar)
                pl.BlockSpec((B, 1), lambda i: (0, 0)),            # label
            ],
            out_specs=(
                pl.BlockSpec((B, 1), lambda i: (0, 0)),
                pl.BlockSpec((B, N), lambda i: (0, 0)),
                pl.BlockSpec((B, N), lambda i: (0, 0)),
                pl.BlockSpec(memory_space=pltpu.MemorySpace.SMEM),
            ),
            scratch_shapes=[pltpu.VMEM((G_pad, Fp), jnp.float32)],
            compiler_params=pltpu.CompilerParams(
                dimension_semantics=("arbitrary",)),  # grid axis is the M reduction
        )(patches, self.w_conv, self.b_conv, pool,
          self.w_attn, self.wh1, self.wh2, self.bh,
          label.reshape(B, 1).astype(jnp.float32))

        return out.reshape(-1), wmax, worg, loss[0, 0]   # output.view(-1), ..., loss


if __name__ == "__main__":
    key = jax.random.PRNGKey(0)
    k_x, k_c1, k_c2, k_c3, k_c4, k_lab, k_model = jax.random.split(key, 7)

    B, C, H, W = 2, 4, 16, 16
    x = jax.random.normal(k_x, (B, C, H, W), jnp.float32)
    # crops: list of lists (as in set_input), 2 sublists x 2 crops, each 8x8
    crops = [
        [jax.random.normal(k_c1, (B, C, 8, 8), jnp.float32),
         jax.random.normal(k_c2, (B, C, 8, 8), jnp.float32)],
        [jax.random.normal(k_c3, (B, C, 8, 8), jnp.float32),
         jax.random.normal(k_c4, (B, C, 8, 8), jnp.float32)],
    ]
    label = (jax.random.uniform(k_lab, (B,)) > 0.5).astype(jnp.float32)

    trainer = TrainerForward(k_model, in_ch=C, feat_dim=32)
    fwd = jax.jit(trainer.forward)
    output, weights_max, weights_org, loss = fwd(x, crops, label)

    jax.block_until_ready((output, weights_max, weights_org, loss))
    assert output.shape == (B,)
    assert weights_max.shape == (B, 4) and weights_org.shape == (B, 4)
    assert loss.shape == ()
    assert bool(jnp.isfinite(loss))
    print("KERNEL_OK")
</pallas_src>

<mosaic_0001>
module attributes {stable_mosaic.version = 11 : i64} {
  func.func @fused_kernel(%arg0: i32, %arg1: memref<512x36xbf16, #tpu.memory_space<vmem>>, %arg2: memref<36x128xbf16, #tpu.memory_space<vmem>>, %arg3: memref<1x128xf32, #tpu.memory_space<vmem>>, %arg4: memref<16x512xf32, #tpu.memory_space<vmem>>, %arg5: memref<1x128xf32, #tpu.memory_space<vmem>>, %arg6: memref<1x128xf32, #tpu.memory_space<vmem>>, %arg7: memref<1x128xf32, #tpu.memory_space<vmem>>, %arg8: memref<1x1xf32, #tpu.memory_space<smem>>, %arg9: memref<2x1xf32, #tpu.memory_space<vmem>>, %arg10: memref<2x1xf32, #tpu.memory_space<vmem>>, %arg11: memref<2x4xf32, #tpu.memory_space<vmem>>, %arg12: memref<2x4xf32, #tpu.memory_space<vmem>>, %arg13: memref<1x1xf32, #tpu.memory_space<smem>>, %arg14: memref<16x128xf32, #tpu.memory_space<vmem>>) attributes {dimension_semantics = [#tpu.dimension_semantics<arbitrary>], iteration_bounds = array<i64: 2>, scalar_prefetch = 0 : i64, scratch_operands = 1 : i64, tpu.core_type = #tpu.core_type<tc>, window_params = [{transform_indices = @transform_0, window_bounds = array<i64: 512, 36>}, {pipeline_mode = #tpu.pipeline_mode<synchronous>, transform_indices = @transform_1, window_bounds = array<i64: 36, 128>}, {pipeline_mode = #tpu.pipeline_mode<synchronous>, transform_indices = @transform_2, window_bounds = array<i64: 1, 128>}, {transform_indices = @transform_3, window_bounds = array<i64: 16, 512>}, {pipeline_mode = #tpu.pipeline_mode<synchronous>, transform_indices = @transform_4, window_bounds = array<i64: 1, 128>}, {pipeline_mode = #tpu.pipeline_mode<synchronous>, transform_indices = @transform_5, window_bounds = array<i64: 1, 128>}, {pipeline_mode = #tpu.pipeline_mode<synchronous>, transform_indices = @transform_6, window_bounds = array<i64: 1, 128>}, {transform_indices = @transform_7, window_bounds = array<i64: 1, 1>}, {pipeline_mode = #tpu.pipeline_mode<synchronous>, transform_indices = @transform_8, window_bounds = array<i64: 2, 1>}, {pipeline_mode = #tpu.pipeline_mode<synchronous>, transform_indices = @transform_9, window_bounds = array<i64: 2, 1>}, {pipeline_mode = #tpu.pipeline_mode<synchronous>, transform_indices = @transform_10, window_bounds = array<i64: 2, 4>}, {pipeline_mode = #tpu.pipeline_mode<synchronous>, transform_indices = @transform_11, window_bounds = array<i64: 2, 4>}, {transform_indices = @transform_12, window_bounds = array<i64: 1, 1>}]} {
    %c0_i32 = arith.constant 0 : i32
    %0 = arith.cmpi eq, %arg0, %c0_i32 : i32
    %1 = arith.extui %0 : i1 to i32
    %c0_i32_0 = arith.constant 0 : i32
    %2 = arith.cmpi ne, %1, %c0_i32_0 : i32
    scf.if %2 {
      %cst_15 = arith.constant 0.000000e+00 : f32
      %19 = vector.broadcast %cst_15 : f32 to vector<16x128xf32>
      %c0_16 = arith.constant 0 : index
      %c0_17 = arith.constant 0 : index
      %20 = vector.load %arg14[%c0_16, %c0_17] : memref<16x128xf32, #tpu.memory_space<vmem>>, vector<16x128xf32>
      tpu.vector_store %arg14[%c0_16, %c0_17], %19 {strides = array<i32>} : memref<16x128xf32, #tpu.memory_space<vmem>>, vector<16x128xf32>,
    } else {
    }
    %c0 = arith.constant 0 : index
    %c0_1 = arith.constant 0 : index
    %3 = vector.load %arg1[%c0, %c0_1] : memref<512x36xbf16, #tpu.memory_space<vmem>>, vector<512x36xbf16>
    %c0_2 = arith.constant 0 : index
    %c0_3 = arith.constant 0 : index
    %4 = vector.load %arg2[%c0_2, %c0_3] : memref<36x128xbf16, #tpu.memory_space<vmem>>, vector<36x128xbf16>
    %cst = arith.constant dense<0.000000e+00> : vector<512x128xf32>
    %5 = tpu.matmul %3, %4, %cst {dimension_numbers = #tpu.dot_dimension_numbers<[1], [0], [0], [1], [0, 0, 1, 1], [], []>} : vector<512x36xbf16>, vector<36x128xbf16>, vector<512x128xf32> -> vector<512x128xf32>
    %c0_4 = arith.constant 0 : index
    %c0_5 = arith.constant 0 : index
    %6 = vector.load %arg3[%c0_4, %c0_5] : memref<1x128xf32, #tpu.memory_space<vmem>>, vector<1x128xf32>
    %7 = vector.broadcast %6 : vector<1x128xf32> to vector<512x128xf32>
    %8 = arith.addf %5, %7 : vector<512x128xf32>
    %cst_6 = arith.constant 0.000000e+00 : f32
    %9 = vector.broadcast %cst_6 : f32 to vector<512x128xf32>
    %10 = arith.maximumf %8, %9 : vector<512x128xf32>
    %c0_7 = arith.constant 0 : index
    %c0_8 = arith.constant 0 : index
    %11 = vector.load %arg14[%c0_7, %c0_8] : memref<16x128xf32, #tpu.memory_space<vmem>>, vector<16x128xf32>
    %c0_9 = arith.constant 0 : index
    %c0_10 = arith.constant 0 : index
    %12 = vector.load %arg4[%c0_9, %c0_10] : memref<16x512xf32, #tpu.memory_space<vmem>>, vector<16x512xf32>
    %cst_11 = arith.constant dense<0.000000e+00> : vector<16x128xf32>
    %13 = tpu.matmul %12, %10, %cst_11 {dimension_numbers = #tpu.dot_dimension_numbers<[1], [0], [0], [1], [0, 0, 1, 1], [], []>} : vector<16x512xf32>, vector<512x128xf32>, vector<16x128xf32> -> vector<16x128xf32>
    %14 = arith.addf %11, %13 : vector<16x128xf32>
    %c0_12 = arith.constant 0 : index
    %c0_13 = arith.constant 0 : index
    %15 = vector.load %arg14[%c0_12, %c0_13] : memref<16x128xf32, #tpu.memory_space<vmem>>, vector<16x128xf32>
    tpu.vector_store %arg14[%c0_12, %c0_13], %14 {strides = array<i32>} : memref<16x128xf32, #tpu.memory_space<vmem>>, vector<16x128xf32>,
    %c1_i32 = arith.constant 1 : i32
    %16 = arith.cmpi eq, %arg0, %c1_i32 : i32
    %17 = arith.extui %16 : i1 to i32
    %c0_i32_14 = arith.constant 0 : i32
    %18 = arith.cmpi ne, %17, %c0_i32_14 : i32
    scf.if %18 {
      %c0_15 = arith.constant 0 : index
      %c0_16 = arith.constant 0 : index
      %19 = vector.load %arg14[%c0_15, %c0_16] : memref<16x128xf32, #tpu.memory_space<vmem>>, vector<16x128xf32>
      %20 = vector.extract_strided_slice %19 {offsets = [0, 0], sizes = [2, 128], strides = [1, 1]} : vector<16x128xf32> to vector<2x128xf32>
      %21 = vector.extract_strided_slice %19 {offsets = [8, 0], sizes = [8, 128], strides = [1, 1]} : vector<16x128xf32> to vector<8x128xf32>
      %22 = vector.shape_cast %21 : vector<8x128xf32> to vector<2x4x128xf32>
      %c0_17 = arith.constant 0 : index
      %c0_18 = arith.constant 0 : index
      %23 = vector.load %arg5[%c0_17, %c0_18] : memref<1x128xf32, #tpu.memory_space<vmem>>, vector<1x128xf32>
      %24 = vector.shape_cast %23 : vector<1x128xf32> to vector<1x1x128xf32>
      %25 = vector.broadcast %24 : vector<1x1x128xf32> to vector<2x4x128xf32>
      %26 = arith.mulf %22, %25 : vector<2x4x128xf32>
      %cst_19 = arith.constant dense<0.000000e+00> : vector<2x4xf32>
      %27 = vector.multi_reduction <add>, %26, %cst_19 [2] : vector<2x4x128xf32> to vector<2x4xf32>
      %cst_20 = arith.constant dense<0xFF800000> : vector<2xf32>
      %28 = vector.multi_reduction <maximumf>, %27, %cst_20 [1] : vector<2x4xf32> to vector<2xf32>
      %29 = vector.shape_cast %28 : vector<2xf32> to vector<2x1xf32>
      %30 = vector.broadcast %29 : vector<2x1xf32> to vector<2x4xf32>
      %31 = arith.subf %27, %30 : vector<2x4xf32>
      %32 = math.exp %31 : vector<2x4xf32>
      %cst_21 = arith.constant dense<0.000000e+00> : vector<2xf32>
      %33 = vector.multi_reduction <add>, %32, %cst_21 [1] : vector<2x4xf32> to vector<2xf32>
      %34 = vector.shape_cast %33 : vector<2xf32> to vector<2x1xf32>
      %35 = tpu.reciprocal %34 {approx = true} : vector<2x1xf32> -> vector<2x1xf32>
      %36 = vector.broadcast %35 : vector<2x1xf32> to vector<2x4xf32>
      %37 = arith.mulf %32, %36 : vector<2x4xf32>
      %cst_22 = arith.constant 1.000000e+01 : f32
      %38 = vector.broadcast %cst_22 : f32 to vector<2x4xf32>
      %39 = arith.mulf %27, %38 : vector<2x4xf32>
      %cst_23 = arith.constant dense<0xFF800000> : vector<2xf32>
      %40 = vector.multi_reduction <maximumf>, %39, %cst_23 [1] : vector<2x4xf32> to vector<2xf32>
      %41 = vector.shape_cast %40 : vector<2xf32> to vector<2x1xf32>
      %42 = vector.broadcast %41 : vector<2x1xf32> to vector<2x4xf32>
      %43 = arith.subf %39, %42 : vector<2x4xf32>
      %44 = math.exp %43 : vector<2x4xf32>
      %cst_24 = arith.constant dense<0.000000e+00> : vector<2xf32>
      %45 = vector.multi_reduction <add>, %44, %cst_24 [1] : vector<2x4xf32> to vector<2xf32>
      %46 = vector.shape_cast %45 : vector<2xf32> to vector<2x1xf32>
      %47 = tpu.reciprocal %46 {approx = true} : vector<2x1xf32> -> vector<2x1xf32>
      %48 = vector.broadcast %47 : vector<2x1xf32> to vector<2x4xf32>
      %49 = arith.mulf %44, %48 : vector<2x4xf32>
      %50 = vector.shape_cast %37 : vector<2x4xf32> to vector<2x4x1xf32>
      %51 = vector.broadcast %50 : vector<2x4x1xf32> to vector<2x4x128xf32>
      %52 = arith.mulf %51, %22 : vector<2x4x128xf32>
      %cst_25 = arith.constant dense<0.000000e+00> : vector<2x128xf32>
      %53 = vector.multi_reduction <add>, %52, %cst_25 [1] : vector<2x4x128xf32> to vector<2x128xf32>
      %c0_26 = arith.constant 0 : index
      %c0_27 = arith.constant 0 : index
      %54 = vector.load %arg6[%c0_26, %c0_27] : memref<1x128xf32, #tpu.memory_space<vmem>>, vector<1x128xf32>
      %55 = vector.broadcast %54 : vector<1x128xf32> to vector<2x128xf32>
      %56 = arith.mulf %20, %55 : vector<2x128xf32>
      %cst_28 = arith.constant dense<0.000000e+00> : vector<2xf32>
      %57 = vector.multi_reduction <add>, %56, %cst_28 [1] : vector<2x128xf32> to vector<2xf32>
      %58 = vector.shape_cast %57 : vector<2xf32> to vector<2x1xf32>
      %c0_29 = arith.constant 0 : index
      %c0_30 = arith.constant 0 : index
      %59 = vector.load %arg7[%c0_29, %c0_30] : memref<1x128xf32, #tpu.memory_space<vmem>>, vector<1x128xf32>
      %60 = vector.broadcast %59 : vector<1x128xf32> to vector<2x128xf32>
      %61 = arith.mulf %53, %60 : vector<2x128xf32>
      %cst_31 = arith.constant dense<0.000000e+00> : vector<2xf32>
      %62 = vector.multi_reduction <add>, %61, %cst_31 [1] : vector<2x128xf32> to vector<2xf32>
      %63 = vector.shape_cast %62 : vector<2xf32> to vector<2x1xf32>
      %64 = arith.addf %58, %63 : vector<2x1xf32>
      %c0_32 = arith.constant 0 : index
      %c0_33 = arith.constant 0 : index
      %65 = memref.load %arg8[%c0_32, %c0_33] : memref<1x1xf32, #tpu.memory_space<smem>>
      %66 = vector.broadcast %65 : f32 to vector<2x1xf32>
      %67 = arith.addf %64, %66 : vector<2x1xf32>
      %c0_34 = arith.constant 0 : index
      %c0_35 = arith.constant 0 : index
      %68 = vector.load %arg9[%c0_34, %c0_35] : memref<2x1xf32, #tpu.memory_space<vmem>>, vector<2x1xf32>
      %69 = vector.shape_cast %67 : vector<2x1xf32> to vector<1x2x1xf32>
      %cst_36 = arith.constant dense<0xFF800000> : vector<1xf32>
      %70 = vector.multi_reduction <maximumf>, %69, %cst_36 [1, 2] : vector<1x2x1xf32> to vector<1xf32>
      %71 = vector.shape_cast %70 : vector<1xf32> to vector<1x1x1xf32>
      %72 = vector.extract %71[0, 0, 0] : f32 from vector<1x1x1xf32>
      %73 = vector.broadcast %72 : f32 to vector<2x1xf32>
      %74 = arith.subf %67, %73 : vector<2x1xf32>
      %75 = math.exp %74 : vector<2x1xf32>
      %76 = vector.shape_cast %75 : vector<2x1xf32> to vector<1x2x1xf32>
      %cst_37 = arith.constant dense<0.000000e+00> : vector<1xf32>
      %77 = vector.multi_reduction <add>, %76, %cst_37 [1, 2] : vector<1x2x1xf32> to vector<1xf32>
      %78 = vector.shape_cast %77 : vector<1xf32> to vector<1x1x1xf32>
      %79 = vector.extract %78[0, 0, 0] : f32 from vector<1x1x1xf32>
      %80 = math.log %79 : f32
      %81 = arith.addf %72, %80 : f32
      %82 = vector.broadcast %81 : f32 to vector<2x1xf32>
      %83 = arith.subf %67, %82 : vector<2x1xf32>
      %84 = arith.mulf %68, %83 : vector<2x1xf32>
      %85 = vector.shape_cast %84 : vector<2x1xf32> to vector<1x2x1xf32>
      %cst_38 = arith.constant dense<0.000000e+00> : vector<1xf32>
      %86 = vector.multi_reduction <add>, %85, %cst_38 [1, 2] : vector<1x2x1xf32> to vector<1xf32>
      %87 = vector.shape_cast %86 : vector<1xf32> to vector<1x1x1xf32>
      %88 = vector.extract %87[0, 0, 0] : f32 from vector<1x1x1xf32>
      %cst_39 = arith.constant 0.000000e+00 : f32
      %89 = arith.subf %cst_39, %88 : f32
      %90 = arith.subf %49, %37 : vector<2x4xf32>
      %91 = arith.mulf %90, %90 : vector<2x4xf32>
      %92 = vector.shape_cast %91 : vector<2x4xf32> to vector<1x2x4xf32>
      %cst_40 = arith.constant dense<0.000000e+00> : vector<1xf32>
      %93 = vector.multi_reduction <add>, %92, %cst_40 [1, 2] : vector<1x2x4xf32> to vector<1xf32>
      %94 = vector.shape_cast %93 : vector<1xf32> to vector<1x1x1xf32>
      %95 = vector.extract %94[0, 0, 0] : f32 from vector<1x1x1xf32>
      %cst_41 = arith.constant 8.000000e+00 : f32
      %96 = arith.divf %95, %cst_41 : f32
      %c0_42 = arith.constant 0 : index
      %c0_43 = arith.constant 0 : index
      %97 = vector.load %arg10[%c0_42, %c0_43] : memref<2x1xf32, #tpu.memory_space<vmem>>, vector<2x1xf32>
      tpu.vector_store %arg10[%c0_42, %c0_43], %67 {strides = array<i32>} : memref<2x1xf32, #tpu.memory_space<vmem>>, vector<2x1xf32>,
      %c0_44 = arith.constant 0 : index
      %c0_45 = arith.constant 0 : index
      %98 = vector.load %arg11[%c0_44, %c0_45] : memref<2x4xf32, #tpu.memory_space<vmem>>, vector<2x4xf32>
      tpu.vector_store %arg11[%c0_44, %c0_45], %49 {strides = array<i32>} : memref<2x4xf32, #tpu.memory_space<vmem>>, vector<2x4xf32>,
      %c0_46 = arith.constant 0 : index
      %c0_47 = arith.constant 0 : index
      %99 = vector.load %arg12[%c0_46, %c0_47] : memref<2x4xf32, #tpu.memory_space<vmem>>, vector<2x4xf32>
      tpu.vector_store %arg12[%c0_46, %c0_47], %37 {strides = array<i32>} : memref<2x4xf32, #tpu.memory_space<vmem>>, vector<2x4xf32>,
      %100 = arith.addf %96, %89 : f32
      %c0_48 = arith.constant 0 : index
      %c0_49 = arith.constant 0 : index
      %101 = memref.load %arg13[%c0_48, %c0_49] : memref<1x1xf32, #tpu.memory_space<smem>>
      memref.store %100, %arg13[%c0_48, %c0_49] : memref<1x1xf32, #tpu.memory_space<smem>>
    } else {
    }
    return
  }
  func.func @transform_0(%arg0: i32) -> (i32, i32) {
    %c0_i32 = arith.constant 0 : i32
    %c0_i32_0 = arith.constant 0 : i32
    return %arg0, %c0_i32 : i32, i32
  }
  func.func @transform_1(%arg0: i32) -> (i32, i32) {
    %c0_i32 = arith.constant 0 : i32
    %c0_i32_0 = arith.constant 0 : i32
    %c0_i32_1 = arith.constant 0 : i32
    return %c0_i32, %c0_i32_0 : i32, i32
  }
  func.func @transform_2(%arg0: i32) -> (i32, i32) {
    %c0_i32 = arith.constant 0 : i32
    %c0_i32_0 = arith.constant 0 : i32
    %c0_i32_1 = arith.constant 0 : i32
    return %c0_i32, %c0_i32_0 : i32, i32
  }
  func.func @transform_3(%arg0: i32) -> (i32, i32) {
    %c0_i32 = arith.constant 0 : i32
    %c0_i32_0 = arith.constant 0 : i32
    return %c0_i32, %arg0 : i32, i32
  }
  func.func @transform_4(%arg0: i32) -> (i32, i32) {
    %c0_i32 = arith.constant 0 : i32
    %c0_i32_0 = arith.constant 0 : i32
    %c0_i32_1 = arith.constant 0 : i32
    return %c0_i32, %c0_i32_0 : i32, i32
  }
  func.func @transform_5(%arg0: i32) -> (i32, i32) {
    %c0_i32 = arith.constant 0 : i32
    %c0_i32_0 = arith.constant 0 : i32
    %c0_i32_1 = arith.constant 0 : i32
    return %c0_i32, %c0_i32_0 : i32, i32
  }
  func.func @transform_6(%arg0: i32) -> (i32, i32) {
    %c0_i32 = arith.constant 0 : i32
    %c0_i32_0 = arith.constant 0 : i32
    %c0_i32_1 = arith.constant 0 : i32
    return %c0_i32, %c0_i32_0 : i32, i32
  }
  func.func @transform_7(%arg0: i32) -> (i32, i32) {
    %c0_i32 = arith.constant 0 : i32
    %c0_i32_0 = arith.constant 0 : i32
    %c0_i32_1 = arith.constant 0 : i32
    return %c0_i32, %c0_i32_0 : i32, i32
  }
  func.func @transform_8(%arg0: i32) -> (i32, i32) {
    %c0_i32 = arith.constant 0 : i32
    %c0_i32_0 = arith.constant 0 : i32
    %c0_i32_1 = arith.constant 0 : i32
    return %c0_i32, %c0_i32_0 : i32, i32
  }
  func.func @transform_9(%arg0: i32) -> (i32, i32) {
    %c0_i32 = arith.constant 0 : i32
    %c0_i32_0 = arith.constant 0 : i32
    %c0_i32_1 = arith.constant 0 : i32
    return %c0_i32, %c0_i32_0 : i32, i32
  }
  func.func @transform_10(%arg0: i32) -> (i32, i32) {
    %c0_i32 = arith.constant 0 : i32
    %c0_i32_0 = arith.constant 0 : i32
    %c0_i32_1 = arith.constant 0 : i32
    return %c0_i32, %c0_i32_0 : i32, i32
  }
  func.func @transform_11(%arg0: i32) -> (i32, i32) {
    %c0_i32 = arith.constant 0 : i32
    %c0_i32_0 = arith.constant 0 : i32
    %c0_i32_1 = arith.constant 0 : i32
    return %c0_i32, %c0_i32_0 : i32, i32
  }
  func.func @transform_12(%arg0: i32) -> (i32, i32) {
    %c0_i32 = arith.constant 0 : i32
    %c0_i32_0 = arith.constant 0 : i32
    %c0_i32_1 = arith.constant 0 : i32
    return %c0_i32, %c0_i32_0 : i32, i32
  }
}

</mosaic_0001>

<bundles_post_ra>
// kernel: forward.1
= control target key start
LH: loop header
LB: loop body
LE: loop exit
PB: predicated region body
PF: predicated region fallthrough
CT: control target
= control target key end

     0   :  { %s2834_s0 = inlined_call_operand.vmem [shape: bf16[1024,36], index: 0, kind: input, shape index: {}]   ;;  %s2835_s1 = inlined_call_operand.vmem [shape: bf16[36,128], index: 1, kind: input, shape index: {}]   ;;  %s2836_s2 = inlined_call_operand.vmem [shape: f32[1,128], index: 2, kind: input, shape index: {}]   ;;  %s2837_s3 = inlined_call_operand.vmem [shape: f32[16,1024], index: 3, kind: input, shape index: {}]   ;;  %s2838_s4 = inlined_call_operand.vmem [shape: f32[1,128], index: 4, kind: input, shape index: {}]   ;;  %s2839_s5 = inlined_call_operand.vmem [shape: f32[1,128], index: 5, kind: input, shape index: {}]   ;;  %s2840_s6 = inlined_call_operand.vmem [shape: f32[1,128], index: 6, kind: input, shape index: {}]   ;;  %s2841_s7 = inlined_call_operand.<no memory space> [shape: f32[1,1], index: 7, kind: input, shape index: {}]   ;;  %s2842_s8 = inlined_call_operand.vmem [shape: f32[2,1], index: 8, kind: input, shape index: {}]   ;;  %s2843_s9 = inlined_call_operand.vmem [shape: f32[2,1], index: 9, kind: output, shape index: {0}]   ;;  %s2844_s10 = inlined_call_operand.hbm [shape: f32[2,4], index: 10, kind: output, shape index: {1}]   ;;  %s2845_s11 = inlined_call_operand.hbm [shape: f32[2,4], index: 11, kind: output, shape index: {2}]   ;;  %s2846_s12 = inlined_call_operand.hbm [shape: f32[1,1], index: 12, kind: output, shape index: {3}]  }
   0x1   :  { %18 = sst [smem:[#allocation3]] %s2841_s7 }
   0x2   :  { %19 = vsyncpa [#allocation6], 0 }
   0x3   :  { %20 = vsyncpa [#allocation9], 0 }
   0x4   :  { %21 = vsyncpa [#allocation7], 0  ;;  %s2407_s23 = smov 0   ;;  %s2409_s24 = smov 0  }
   0x5   :  { %s2411_s25 = smov 0  }
   0x6 LB: > { %s2423_s7 = sadd.s32 4294967295, %s2332_s25   ;;  %s2426_s26 = sadd.s32 1, %s2332_s25   ;;  %s2332_s25 = sphi %s2411_s25, %s2849_s25   ;;  %s2328_s24 = sphi %s2409_s24, %s2848_s24   ;;  %s2324_s23 = sphi %s2407_s23, %s2847_s23  }
   0x7   : > { %s99_s27 = ssub.s32 %s2332_s25, %s2426_s26  ;;  %s102_s28 = sadd.s32 1, %s2328_s24 }
   0x8   : > { %p100_p0 = scmp.eq.s32.totalorder %s99_s27, 0  ;;  %p109_p1 = scmp.ne.s32.totalorder %s2328_s24, %s2324_s23 }
   0x9   : > { %p110_p2 = scmp.eq.s32.totalorder %s2332_s25, 0  ;;  %p1780_p4 = scmp.ge.s32.totalorder %s2332_s25, 2 }
   0xa   : > { %s2435_s29 = scalar_select %p100_p0, %s2328_s24, %s102_s28  }
   0xb   : > { %p111_p3 = por %p110_p2, %p109_p1  ;;  %345 = sbr.rel (%p1780_p4) target bundleno = 26 (0x1a), region = 44 }
  0x12   : > { %357 = sbr.rel (!%p111_p3) target bundleno = 26 (0x1a), region = 52  ;;  %s359_s30 = sand.u32 (%p111_p3), 1, %s2328_s24  }
  0x13   : > { %s1869_s13 = sshll.u32 (%p111_p3), %s2332_s25, 5  ;;  %s1781_s14 = sshll.u32 (%p111_p3), %s359_s30, 6 }
  0x14   : > { %s364_s17 = scalar_lea.vmem (%p111_p3), %s2837_s3, %s1869_s13  ;;  %s361_s18 = scalar_lea.vmem (%p111_p3), [#allocation4], %s1781_s14 }
  0x15   : > { %v377_v0 = vld [vmem:[%s364_s17] sm:$0xff] (%p111_p3)  ;;  %v379_v1 = vld [vmem:[%s364_s17 + $0x8] sm:$0xff] (%p111_p3)  ;;  %v381_v2 = vld [vmem:[%s364_s17 + $0x10] sm:$0xff] (%p111_p3) }
  0x16   : > { %378 = vst [vmem:[%s361_s18] sm:$0xff] (%p111_p3), %v377_v0  ;;  %380 = vst [vmem:[%s361_s18 + $0x8] sm:$0xff] (%p111_p3), %v379_v1  ;;  %v383_v3 = vld [vmem:[%s364_s17 + $0x18] sm:$0xff] (%p111_p3)  ;;  %v385_v4 = vld [vmem:[%s364_s17 + $0x40] sm:$0xff] (%p111_p3) }
  0x17   : > { %382 = vst [vmem:[%s361_s18 + $0x10] sm:$0xff] (%p111_p3), %v381_v2  ;;  %v387_v5 = vld [vmem:[%s364_s17 + $0x48] sm:$0xff] (%p111_p3)  ;;  %384 = vst [vmem:[%s361_s18 + $0x18] sm:$0xff] (%p111_p3), %v383_v3  ;;  %v389_v6 = vld [vmem:[%s364_s17 + $0x50] sm:$0xff] (%p111_p3) }
  0x18   : > { %386 = vst [vmem:[%s361_s18 + $0x20] sm:$0xff] (%p111_p3), %v385_v4  ;;  %388 = vst [vmem:[%s361_s18 + $0x28] sm:$0xff] (%p111_p3), %v387_v5  ;;  %v391_v7 = vld [vmem:[%s364_s17 + $0x58] sm:$0xff] (%p111_p3) }
  0x19   : > { %390 = vst [vmem:[%s361_s18 + $0x30] sm:$0xff] %v389_v6  ;;  %392 = vst [vmem:[%s361_s18 + $0x38] sm:$0xff] %v391_v7 }
  0x1a PF: > { %p1784_p5 = scmp.ge.s32.totalorder %s2332_s25, 1  ;;  %p397_p6 = scmp.lt.s32.totalorder %s2332_s25, 3 }
  0x1c   : > { %p398_p7 = pnand %p1784_p5, %p397_p6 }
  0x1d   : > { %s404_s19 = sand.u32 (!%p398_p7), 1, %s2324_s23   ;;  %s1786_s20 = sshll.u32 (!%p398_p7), %s2423_s7, 6 }
  0x1e   : > { %401 = sbr.rel (%p398_p7) target bundleno = 2133 (0x855), region = 75  ;;  %s1785_s21 = sshll.u32 (!%p398_p7), %s404_s19, 6 }
  0x1f   : > { %p446_p8 = scmp.lt.s32.totalorder (!%p398_p7), %s1786_s20, 127  ;;  %s2452_s13 = scalar_lea.vmem (!%p398_p7), [#allocation4], %s1785_s21 }
  0x20   : > { %p1788_p9 = scmp.ne.s32.totalorder (!%p398_p7), %s2423_s7, 0 }
  0x25   : > { %s2851_s20 = smov (!%p446_p8, %s1786_s20), 127  ;;  %456 = sbr.rel (%p1788_p9) target bundleno = 44 (0x2c), region = 83 }
  0x26   : > { %s1787_s22 = sshll.u32 %s2851_s20, 2  ;;  %v2334_v8 = vmov (!%p1788_p9), 0.0  }
  0x27   : > { %s2450_s30 = scalar_lea.vmem %s2834_s0, %s1787_s22  ;;  %457 = vst [vmem:[#allocation2] sm:$0xff] (!%p1788_p9), %v2334_v8  ;;  %458 = vst [vmem:[#allocation2 + $0x8] sm:$0xff] (!%p1788_p9), %v2334_v8 }
  0x2c PF: > { %v2180_v9 = vld [vmem:[%s2835_s1] sm:$0xff]   ;;  %v2181_v10 = vld [vmem:[%s2835_s1 + $0x8] sm:$0xff]   ;;  %vm710_vm0 = vcmask 293888   ;;  %v2182_v11 = vld [vmem:[%s2835_s1 + $0x10] ss:$0 sps:$4 sm:$0x33]  }
  0x2d   : > { %1981 = vmatprep.subr.bf16.mxu0 %v2180_v9  ;;  %v2183_v12 = vld [vmem:[%s2450_s30] sm:$0xff]   ;;  %2115 = vmatprep.subr.bf16.mxu1 %v2180_v9  ;;  %vm807_vm1 = vcmask 1041408   ;;  %v2184_v14 = vld [vmem:[%s2450_s30 + $0x8] sm:$0xff]   ;;  %v2185_v15 = vld [vmem:[%s2450_s30 + $0x10] sm:$0xff]   ;;  %p1857_p10 = scmp.ne.s32.totalorder %s2423_s7, 1 }
  0x2e   : > { %1982 = vmatpush3.bf16.msra.mxu0 %v2180_v9  ;;  %2118 = vmatpush3.bf16.msra.mxu1 %v2180_v9  ;;  %v809_v13 = vsel %vm807_vm1, %v2182_v11, 0  ;;  %v2186_v16 = vld [vmem:[%s2450_s30 + $0x18] sm:$0xff]   ;;  %v2198_v17 = vld [vmem:[%s2450_s30 + $0xb0] sm:$0xff]   ;;  %v2187_v18 = vld [vmem:[%s2450_s30 + $0x20] sm:$0xff]   ;;  %vm1346_vm2 = vcmask (!%p1857_p10), 1043456   ;;  %vm1365_vm3 = vcmask (!%p1857_p10), 1041409  }
  0x2f   : > { %1983 = vmatprep.subr.bf16.mxu0 %v2181_v10  ;;  %1987 = vmatprep.mubr.msk.bf16.mxu0 %vm710_vm0, %v2183_v12  ;;  %v2200_v19 = vld [vmem:[%s2450_s30 + $0xb8] sm:$0xff]   ;;  %v2201_v20 = vld [vmem:[%s2450_s30 + $0xc0] sm:$0xff]   ;;  %v2188_v21 = vld [vmem:[%s2450_s30 + $0x28] sm:$0xff]   ;;  %vm1368_vm4 = vcmask (!%p1857_p10), 25600   ;;  %vm1564_vm5 = vcmask (!%p1857_p10), 1024  }
  0x30   : > { %2116 = vmatprep.subr.bf16.mxu1 %v2181_v10  ;;  %2031 = vmatprep.mubr.msk.bf16.mxu1 %vm710_vm0, %v2198_v17  ;;  %v2189_v22 = vld [vmem:[%s2450_s30 + $0x30] sm:$0xff]   ;;  %v2203_v23 = vld [vmem:[%s2450_s30 + $0xc8] sm:$0xff]   ;;  %v2190_v25 = vld [vmem:[%s2450_s30 + $0x38] sm:$0xff]  }
  0x31   : > { %v2205_v24 = vld [vmem:[%s2450_s30 + $0xd0] sm:$0xff]   ;;  %v2207_v26 = vld [vmem:[%s2450_s30 + $0xd8] sm:$0xff]   ;;  %v2191_v27 = vld [vmem:[%s2450_s30 + $0x40] sm:$0xff]  }
  0x32   : > { %1984 = vmatpush3.bf16.msra.mxu0 %v2181_v10  ;;  %2119 = vmatpush3.bf16.msra.mxu1 %v2181_v10  ;;  %v2209_v28 = vld [vmem:[%s2450_s30 + $0xe0] sm:$0xff]   ;;  %v2192_v29 = vld [vmem:[%s2450_s30 + $0x48] sm:$0xff]   ;;  %v2193_v31 = vld [vmem:[%s2450_s30 + $0x50] sm:$0xff]  }
  0x33   : > { %2121 = vmatprep.subr.msk.bf16.mxu0 %vm807_vm1, %v2182_v11  ;;  %2122 = vmatprep.subr.msk.bf16.mxu1 %vm807_vm1, %v2182_v11  ;;  %v2211_v30 = vld [vmem:[%s2450_s30 + $0xe8] sm:$0xff]   ;;  %v2213_v32 = vld [vmem:[%s2450_s30 + $0xf0] sm:$0xff]   ;;  %v2194_v33 = vld [vmem:[%s2450_s30 + $0x58] sm:$0xff]  }
  0x34   : > { %v2214_v34 = vld [vmem:[%s2450_s30 + $0xf8] sm:$0xff]   ;;  %v2195_v35 = vld [vmem:[%s2450_s30 + $0x60] sm:$0xff]   ;;  %v2196_v36 = vld [vmem:[%s2450_s30 + $0x68] sm:$0xff]  }
  0x35   : > { %v2197_v37 = vld [vmem:[%s2450_s30 + $0x70] sm:$0xff]   ;;  %v2199_v38 = vld [vmem:[%s2450_s30 + $0x78] sm:$0xff]   ;;  %v2202_v39 = vld [vmem:[%s2450_s30 + $0x80] sm:$0xff]  }
  0x36   : > { %1986 = vmatpush3.bf16.msra.mxu0 %v809_v13  ;;  %2120 = vmatpush3.bf16.msra.mxu1 %v809_v13  ;;  %v2204_v40 = vld [vmem:[%s2450_s30 + $0x88] sm:$0xff]   ;;  %v2206_v41 = vld [vmem:[%s2450_s30 + $0x90] sm:$0xff]   ;;  %v2208_v42 = vld [vmem:[%s2450_s30 + $0x98] sm:$0xff]  }
  0x37   : > { %v2210_v43 = vld [vmem:[%s2450_s30 + $0xa0] sm:$0xff]   ;;  %v2212_v44 = vld [vmem:[%s2450_s30 + $0xa8] sm:$0xff]   ;;  %v1167_v45 = vld [vmem:[%s2452_s13 + $0x8] sm:$0xff] }
  0x38   : > { %v2535_v46 = vld [vmem:[%s2836_s2] ss:$0 sm:$0xff] }
  0x39   : > { %1988 = vmatmul.mubr.msk.bf16.vlgmr.msra.gmra.mrb[0].mxu0 %vm710_vm0, %v2184_v14  ;;  %2032 = vmatmul.mubr.msk.bf16.vlgmr.msra.gmra.mrb[0].mxu1 %vm710_vm0, %v2200_v19 }
  0x3a   : > { %1991 = vmatprep.mubr.msk.bf16.mxu0 %vm710_vm0, %v2185_v15  ;;  %2035 = vmatprep.mubr.msk.bf16.mxu1 %vm710_vm0, %v2201_v20 }
  0x41   : > { %1992 = vmatmul.mubr.msk.bf16.gmra.mrb[4].mxu0 %vm710_vm0, %v2186_v16  ;;  %2036 = vmatmul.mubr.msk.bf16.gmra.mrb[4].mxu1 %vm710_vm0, %v2203_v23 }
  0x42   : > { %1995 = vmatprep.mubr.msk.bf16.mxu0 %vm710_vm0, %v2187_v18  ;;  %2039 = vmatprep.mubr.msk.bf16.mxu1 %vm710_vm0, %v2205_v24 }
  0x49   : > { %1996 = vmatmul.mubr.msk.bf16.gmra.mrb[8].mxu0 %vm710_vm0, %v2188_v21  ;;  %2040 = vmatmul.mubr.msk.bf16.gmra.mrb[8].mxu1 %vm710_vm0, %v2207_v26 }
  0x4a   : > { %1999 = vmatprep.mubr.msk.bf16.mxu0 %vm710_vm0, %v2189_v22  ;;  %2043 = vmatprep.mubr.msk.bf16.mxu1 %vm710_vm0, %v2209_v28 }
  0x51   : > { %2000 = vmatmul.mubr.msk.bf16.gmra.mrb[12].mxu0 %vm710_vm0, %v2190_v25  ;;  %2044 = vmatmul.mubr.msk.bf16.gmra.mrb[12].mxu1 %vm710_vm0, %v2211_v30 }
  0x52   : > { %2003 = vmatprep.mubr.msk.bf16.mxu0 %vm710_vm0, %v2191_v27  ;;  %2047 = vmatprep.mubr.msk.bf16.mxu1 %vm710_vm0, %v2213_v32 }
  0x59   : > { %2004 = vmatmul.mubr.msk.bf16.gmra.mrb[16].mxu0 %vm710_vm0, %v2192_v29  ;;  %2048 = vmatmul.mubr.msk.bf16.gmra.mrb[16].mxu1 %vm710_vm0, %v2214_v34 }
  0x5a   : > { %2007 = vmatprep.mubr.msk.bf16.mxu0 %vm710_vm0, %v2193_v31  ;;  %1238 = vmatprep.mubr.f32.mxu1 %v1167_v45 }
  0x61   : > { %2008 = vmatmul.mubr.msk.bf16.gmra.mrb[20].mxu0 %vm710_vm0, %v2194_v33 }
  0x62   : > { %2011 = vmatprep.mubr.msk.bf16.mxu0 %vm710_vm0, %v2195_v35 }
  0x69   : > { %2012 = vmatmul.mubr.msk.bf16.gmra.mrb[24].mxu0 %vm710_vm0, %v2196_v36 }
  0x6a   : > { %2015 = vmatprep.mubr.msk.bf16.mxu0 %vm710_vm0, %v2197_v37 }
  0x71   : > { %2016 = vmatmul.mubr.msk.bf16.gmra.mrb[28].mxu0 %vm710_vm0, %v2199_v38 }
  0x72   : > { %2019 = vmatprep.mubr.msk.bf16.mxu0 %vm710_vm0, %v2202_v39 }
  0x79   : > { %2020 = vmatmul.mubr.msk.bf16.gmra.mrb[32].mxu0 %vm710_vm0, %v2204_v40 }
  0x7a   : > { %2023 = vmatprep.mubr.msk.bf16.mxu0 %vm710_vm0, %v2206_v41 }
  0x81   : > { %2024 = vmatmul.mubr.msk.bf16.gmra.mrb[36].mxu0 %vm710_vm0, %v2208_v42 }
  0x82   : > { %2027 = vmatprep.mubr.msk.bf16.mxu0 %vm710_vm0, %v2210_v43 }
  0x89   : > { %2028 = vmatmul.mubr.msk.bf16.gmra.mrb[40].mxu0 %vm710_vm0, %v2212_v44 }
 0x10c   : > { %v1989_v47 = vpop.f32.mrb[0].mxu0  ;;  %v2033_v62 = vpop.f32.mrb[0].mxu1 }
 0x10d   : > { %v854_v48 = vadd.f32 %v1989_v47, %v2535_v46  ;;  %v845_v49 = vpop.f32.mrb[1].mxu0  ;;  %v1030_v1 = vadd.f32 %v2033_v62, %v2535_v46  ;;  %v1021_v2 = vpop.f32.mrb[1].mxu1 }
 0x10e   : > { %v846_v50 = vadd.f32 %v2535_v46, %v845_v49  ;;  %v1990_v51 = vpop.f32.mrb[2].mxu0  ;;  %v1022_v5 = vadd.f32 %v2535_v46, %v1021_v2  ;;  %v2034_v6 = vpop.f32.mrb[2].mxu1 }
 0x10f   : > { %v857_v52 = vadd.f32 %v1990_v51, %v2535_v46  ;;  %v848_v53 = vpop.f32.mrb[3].mxu0  ;;  %v1102_v55 = vmax.f32 %v854_v48, 0.0  ;;  %v1146_v9 = vmax.f32 %v1030_v1, 0.0  ;;  %v1033_v10 = vadd.f32 %v2034_v6, %v2535_v46  ;;  %v1024_v11 = vpop.f32.mrb[3].mxu1 }
 0x110   : > { %v849_v54 = vadd.f32 %v2535_v46, %v848_v53  ;;  %v1100_v57 = vmax.f32 %v846_v50, 0.0  ;;  %v1144_v13 = vmax.f32 %v1022_v5, 0.0  ;;  %v1025_v14 = vadd.f32 %v2535_v46, %v1024_v11 }
 0x111   : > { %v1103_v56 = vmax.f32 %v857_v52, 0.0  ;;  %v1147_v17 = vmax.f32 %v1033_v10, 0.0 }
 0x112   : > { %v1101_v58 = vmax.f32 %v849_v54, 0.0  ;;  %v1145_v20 = vmax.f32 %v1025_v14, 0.0 }
 0x113   : > { %v2541_v59 = vpack.c.bf16 %v1103_v56, %v1102_v55  ;;  %v2555_v22 = vpack.c.bf16 %v1147_v17, %v1146_v9 }
 0x114   : > { %v2543_v60 = vpack.c.bf16 %v1101_v58, %v1100_v57  ;;  %v1993_v61 = vpop.f32.mrb[4].mxu0  ;;  %v2559_v25 = vpack.c.bf16 %v1145_v20, %v1144_v13  ;;  %v2037_v26 = vpop.f32.mrb[4].mxu1 }
 0x115   : > { %v870_v63 = vadd.f32 %v1993_v61, %v2535_v46  ;;  %v861_v0 = vpop.f32.mrb[5].mxu0  ;;  %v1046_v29 = vadd.f32 %v2037_v26, %v2535_v46  ;;  %v1037_v30 = vpop.f32.mrb[5].mxu1 }
 0x116   : > { %v862_v3 = vadd.f32 %v2535_v46, %v861_v0  ;;  %v1994_v4 = vpop.f32.mrb[6].mxu0  ;;  %v1038_v33 = vadd.f32 %v2535_v46, %v1037_v30  ;;  %v2038_v34 = vpop.f32.mrb[6].mxu1 }
 0x117   : > { %v873_v7 = vadd.f32 %v1994_v4, %v2535_v46  ;;  %v864_v8 = vpop.f32.mrb[7].mxu0  ;;  %v1106_v15 = vmax.f32 %v870_v63, 0.0  ;;  %v1150_v37 = vmax.f32 %v1046_v29, 0.0  ;;  %v1049_v38 = vadd.f32 %v2038_v34, %v2535_v46  ;;  %v1040_v39 = vpop.f32.mrb[7].mxu1 }
 0x118   : > { %v865_v12 = vadd.f32 %v2535_v46, %v864_v8  ;;  %v1104_v18 = vmax.f32 %v862_v3, 0.0  ;;  %v1148_v41 = vmax.f32 %v1038_v33, 0.0  ;;  %v1041_v42 = vadd.f32 %v2535_v46, %v1040_v39 }
 0x119   : > { %v1107_v16 = vmax.f32 %v873_v7, 0.0  ;;  %v1151_v45 = vmax.f32 %v1049_v38, 0.0 }
 0x11a   : > { %v1105_v19 = vmax.f32 %v865_v12, 0.0  ;;  %v1149_v49 = vmax.f32 %v1041_v42, 0.0 }
 0x11b   : > { %v2553_v21 = vpack.c.bf16 %v1107_v16, %v1106_v15  ;;  %v2571_v51 = vpack.c.bf16 %v1151_v45, %v1150_v37 }
 0x11c   : > { %v2557_v23 = vpack.c.bf16 %v1105_v19, %v1104_v18  ;;  %v1997_v24 = vpop.f32.mrb[8].mxu0  ;;  %v2575_v54 = vpack.c.bf16 %v1149_v49, %v1148_v41  ;;  %v2041_v55 = vpop.f32.mrb[8].mxu1 }
 0x11d   : > { %v886_v27 = vadd.f32 %v1997_v24, %v2535_v46  ;;  %v877_v28 = vpop.f32.mrb[9].mxu0  ;;  %v1062_v58 = vadd.f32 %v2041_v55, %v2535_v46  ;;  %v1053_v61 = vpop.f32.mrb[9].mxu1 }
 0x11e   : > { %v878_v31 = vadd.f32 %v2535_v46, %v877_v28  ;;  %v1998_v32 = vpop.f32.mrb[10].mxu0  ;;  %v1054_v0 = vadd.f32 %v2535_v46, %v1053_v61  ;;  %v2042_v1 = vpop.f32.mrb[10].mxu1 }
 0x11f   : > { %v889_v35 = vadd.f32 %v1998_v32, %v2535_v46  ;;  %v880_v36 = vpop.f32.mrb[11].mxu0  ;;  %v1110_v43 = vmax.f32 %v886_v27, 0.0  ;;  %v1154_v4 = vmax.f32 %v1062_v58, 0.0  ;;  %v1065_v5 = vadd.f32 %v2042_v1, %v2535_v46  ;;  %v1056_v6 = vpop.f32.mrb[11].mxu1 }
 0x120   : > { %v881_v40 = vadd.f32 %v2535_v46, %v880_v36  ;;  %v1108_v47 = vmax.f32 %v878_v31, 0.0  ;;  %v1152_v8 = vmax.f32 %v1054_v0, 0.0  ;;  %v1057_v9 = vadd.f32 %v2535_v46, %v1056_v6 }
 0x121   : > { %v1111_v44 = vmax.f32 %v889_v35, 0.0  ;;  %v1155_v12 = vmax.f32 %v1065_v5, 0.0 }
 0x122   : > { %v1109_v48 = vmax.f32 %v881_v40, 0.0  ;;  %v1153_v15 = vmax.f32 %v1057_v9, 0.0 }
 0x123   : > { %v2569_v50 = vpack.c.bf16 %v1111_v44, %v1110_v43  ;;  %v2587_v17 = vpack.c.bf16 %v1155_v12, %v1154_v4 }
 0x124   : > { %v2573_v52 = vpack.c.bf16 %v1109_v48, %v1108_v47  ;;  %v2001_v53 = vpop.f32.mrb[12].mxu0  ;;  %v2591_v20 = vpack.c.bf16 %v1153_v15, %v1152_v8  ;;  %v2045_v24 = vpop.f32.mrb[12].mxu1 }
 0x125   : > { %v902_v56 = vadd.f32 %v2001_v53, %v2535_v46  ;;  %v893_v57 = vpop.f32.mrb[13].mxu0  ;;  %v1078_v28 = vadd.f32 %v2045_v24, %v2535_v46  ;;  %v1069_v29 = vpop.f32.mrb[13].mxu1 }
 0x126   : > { %v894_v62 = vadd.f32 %v2535_v46, %v893_v57  ;;  %v2002_v63 = vpop.f32.mrb[14].mxu0  ;;  %v1070_v32 = vadd.f32 %v2535_v46, %v1069_v29  ;;  %v2046_v33 = vpop.f32.mrb[14].mxu1 }
 0x127   : > { %v905_v2 = vadd.f32 %v2002_v63, %v2535_v46  ;;  %v896_v3 = vpop.f32.mrb[15].mxu0  ;;  %v1114_v10 = vmax.f32 %v902_v56, 0.0  ;;  %v1158_v36 = vmax.f32 %v1078_v28, 0.0  ;;  %v1081_v37 = vadd.f32 %v2046_v33, %v2535_v46  ;;  %v1072_v38 = vpop.f32.mrb[15].mxu1 }
 0x128   : > { %v897_v7 = vadd.f32 %v2535_v46, %v896_v3  ;;  %v1112_v13 = vmax.f32 %v894_v62, 0.0  ;;  %v1156_v40 = vmax.f32 %v1070_v32, 0.0  ;;  %v1073_v41 = vadd.f32 %v2535_v46, %v1072_v38 }
 0x129   : > { %v1115_v11 = vmax.f32 %v905_v2, 0.0  ;;  %v1159_v44 = vmax.f32 %v1081_v37, 0.0 }
 0x12a   : > { %v1113_v14 = vmax.f32 %v897_v7, 0.0  ;;  %v1157_v48 = vmax.f32 %v1073_v41, 0.0 }
 0x12b   : > { %v2585_v16 = vpack.c.bf16 %v1115_v11, %v1114_v10  ;;  %v2601_v53 = vpack.c.bf16 %v1159_v44, %v1158_v36 }
 0x12c   : > { %v2589_v18 = vpack.c.bf16 %v1113_v14, %v1112_v13  ;;  %v2005_v19 = vpop.f32.mrb[16].mxu0  ;;  %v2603_v57 = vpack.c.bf16 %v1157_v48, %v1156_v40  ;;  %v2049_v58 = vpop.f32.mrb[16].mxu1 }
 0x12d   : > { %v918_v26 = vadd.f32 %v2005_v19, %v2535_v46  ;;  %v909_v27 = vpop.f32.mrb[17].mxu0  ;;  %v1094_v63 = vadd.f32 %v2049_v58, %v2535_v46  ;;  %v1085_v0 = vpop.f32.mrb[17].mxu1 }
 0x12e   : > { %v910_v30 = vadd.f32 %v2535_v46, %v909_v27  ;;  %v2006_v31 = vpop.f32.mrb[18].mxu0  ;;  %v1086_v3 = vadd.f32 %v2535_v46, %v1085_v0  ;;  %v2050_v4 = vpop.f32.mrb[18].mxu1 }
 0x12f   : > { %v921_v34 = vadd.f32 %v2006_v31, %v2535_v46  ;;  %v912_v35 = vpop.f32.mrb[19].mxu0  ;;  %v1118_v42 = vmax.f32 %v918_v26, 0.0  ;;  %v1162_v7 = vmax.f32 %v1094_v63, 0.0  ;;  %v1097_v8 = vadd.f32 %v2050_v4, %v2535_v46  ;;  %v1088_v9 = vpop.f32.mrb[19].mxu1 }
 0x130   : > { %v913_v39 = vadd.f32 %v2535_v46, %v912_v35  ;;  %v1116_v45 = vmax.f32 %v910_v30, 0.0  ;;  %v1160_v11 = vmax.f32 %v1086_v3, 0.0  ;;  %v1089_v12 = vadd.f32 %v2535_v46, %v1088_v9 }
 0x131   : > { %v1119_v43 = vmax.f32 %v921_v34, 0.0  ;;  %v1163_v15 = vmax.f32 %v1097_v8, 0.0 }
 0x132   : > { %v1117_v47 = vmax.f32 %v913_v39, 0.0  ;;  %v1161_v26 = vmax.f32 %v1089_v12, 0.0 }
 0x133   : > { %v2055_v49 = vpack.c.bf16 %v1119_v43, %v1118_v42 }
 0x134   : > { %v2051_v55 = vpack.c.bf16 %v1117_v47, %v1116_v45  ;;  %v2009_v56 = vpop.f32.mrb[20].mxu0  ;;  %v2617_v30 = vpack.c.bf16 %v1161_v26, %v1160_v11  ;;  %v1166_v11 = vld [vmem:[%s2452_s13] sm:$0xff] }
 0x135   : > { %v934_v61 = vadd.f32 %v2009_v56, %v2535_v46  ;;  %v925_v62 = vpop.f32.mrb[21].mxu0 }
 0x136   : > { %v926_v1 = vadd.f32 %v2535_v46, %v925_v62  ;;  %v2010_v2 = vpop.f32.mrb[22].mxu0  ;;  %2052 = vmatprep.subr.bf16.mxu1 %v2051_v55 }
 0x137   : > { %v937_v5 = vadd.f32 %v2010_v2, %v2535_v46  ;;  %v928_v6 = vpop.f32.mrb[23].mxu0  ;;  %2054 = vmatpush3.bf16.msra.mxu1 %v2543_v60  ;;  %v1122_v13 = vmax.f32 %v934_v61, 0.0  ;;  %v2615_v60 = vpack.c.bf16 %v1163_v15, %v1162_v7 }
 0x138   : > { %v929_v10 = vadd.f32 %v2535_v46, %v928_v6  ;;  %2056 = vmatprep.subr.bf16.mxu1 %v2055_v49  ;;  %v1120_v19 = vmax.f32 %v926_v1, 0.0 }
 0x139   : > { %v1123_v14 = vmax.f32 %v937_v5, 0.0 }
 0x13a   : > { %v1121_v24 = vmax.f32 %v929_v10, 0.0 }
 0x13b   : > { %v2063_v27 = vpack.c.bf16 %v1123_v14, %v1122_v13  ;;  %2058 = vmatpush3.bf16.msra.mxu1 %v2541_v59  ;;  %v1171_v14 = vld [vmem:[%s2452_s13 + $0x28] sm:$0xff] }
 0x13c   : > { %v2059_v28 = vpack.c.bf16 %v1121_v24, %v1120_v19  ;;  %v2013_v29 = vpop.f32.mrb[24].mxu0 }
 0x13d   : > { %v950_v31 = vadd.f32 %v2013_v29, %v2535_v46  ;;  %v941_v32 = vpop.f32.mrb[25].mxu0 }
 0x13e   : > { %v942_v33 = vadd.f32 %v2535_v46, %v941_v32  ;;  %v2014_v34 = vpop.f32.mrb[26].mxu0  ;;  %2060 = vmatprep.subr.bf16.mxu1 %v2059_v28  ;;  %v1170_v28 = vld [vmem:[%s2452_s13 + $0x20] sm:$0xff] }
 0x13f   : > { %v953_v35 = vadd.f32 %v2014_v34, %v2535_v46  ;;  %v944_v36 = vpop.f32.mrb[27].mxu0  ;;  %2062 = vmatpush3.bf16.msra.mxu1 %v2557_v23  ;;  %v1126_v37 = vmax.f32 %v950_v31, 0.0 }
 0x140   : > { %v945_v59 = vadd.f32 %v2535_v46, %v944_v36  ;;  %2064 = vmatprep.subr.bf16.mxu1 %v2063_v27  ;;  %v1124_v39 = vmax.f32 %v942_v33, 0.0 }
 0x141   : > { %v1127_v38 = vmax.f32 %v953_v35, 0.0 }
 0x142   : > { %v1125_v40 = vmax.f32 %v945_v59, 0.0 }
 0x143   : > { %v2071_v41 = vpack.c.bf16 %v1127_v38, %v1126_v37  ;;  %2066 = vmatpush3.bf16.msra.mxu1 %v2553_v21 }
 0x144   : > { %v2067_v42 = vpack.c.bf16 %v1125_v40, %v1124_v39  ;;  %v2017_v43 = vpop.f32.mrb[28].mxu0 }
 0x145   : > { %v966_v44 = vadd.f32 %v2017_v43, %v2535_v46  ;;  %v957_v45 = vpop.f32.mrb[29].mxu0 }
 0x146   : > { %v958_v47 = vadd.f32 %v2535_v46, %v957_v45  ;;  %v2018_v48 = vpop.f32.mrb[30].mxu0  ;;  %2068 = vmatprep.subr.bf16.mxu1 %v2067_v42 }
 0x147   : > { %v969_v23 = vadd.f32 %v2018_v48, %v2535_v46  ;;  %v960_v49 = vpop.f32.mrb[31].mxu0  ;;  %2070 = vmatpush3.bf16.msra.mxu1 %v2573_v52  ;;  %v1130_v56 = vmax.f32 %v966_v44, 0.0  ;;  %v1172_v48 = vld [vmem:[%s2452_s13 + $0x30] sm:$0xff] }
 0x148   : > { %v961_v55 = vadd.f32 %v2535_v46, %v960_v49  ;;  %2072 = vmatprep.subr.bf16.mxu1 %v2071_v41  ;;  %v1128_v21 = vmax.f32 %v958_v47, 0.0 }
 0x149   : > { %v1131_v58 = vmax.f32 %v969_v23, 0.0 }
 0x14a   : > { %v1129_v61 = vmax.f32 %v961_v55, 0.0 }
 0x14b   : > { %v2079_v62 = vpack.c.bf16 %v1131_v58, %v1130_v56  ;;  %2074 = vmatpush3.bf16.msra.mxu1 %v2569_v50 }
 0x14c   : > { %v2075_v63 = vpack.c.bf16 %v1129_v61, %v1128_v21  ;;  %v2021_v0 = vpop.f32.mrb[32].mxu0 }
 0x14d   : > { %v982_v1 = vadd.f32 %v2021_v0, %v2535_v46  ;;  %v973_v2 = vpop.f32.mrb[33].mxu0  ;;  %v1165_v0 = vld [vmem:[#allocation2 + $0x8] sm:$0xff] }
 0x14e   : > { %v974_v3 = vadd.f32 %v2535_v46, %v973_v2  ;;  %2076 = vmatprep.subr.bf16.mxu1 %v2075_v63  ;;  %v2022_v52 = vpop.f32.mrb[34].mxu0 }
 0x14f   : > { %v1134_v4 = vmax.f32 %v982_v1, 0.0  ;;  %v985_v5 = vadd.f32 %v2022_v52, %v2535_v46  ;;  %2078 = vmatpush3.bf16.msra.mxu1 %v2589_v18  ;;  %v976_v6 = vpop.f32.mrb[35].mxu0  ;;  %v1858_v52 = vld [vmem:[%s2838_s4] ss:$0 sm:$0xff] (!%p1857_p10) }
 0x150   : > { %v977_v7 = vadd.f32 %v2535_v46, %v976_v6  ;;  %2080 = vmatprep.subr.bf16.mxu1 %v2079_v62  ;;  %v1132_v8 = vmax.f32 %v974_v3, 0.0 }
 0x151   : > { %v1135_v50 = vmax.f32 %v985_v5, 0.0 }
 0x152   : > { %v1133_v9 = vmax.f32 %v977_v7, 0.0 }
 0x153   : > { %v2089_v10 = vpack.c.bf16 %v1135_v50, %v1134_v4  ;;  %2082 = vmatpush3.bf16.msra.mxu1 %v2585_v16 }
 0x154   : > { %v2085_v12 = vpack.c.bf16 %v1133_v9, %v1132_v8  ;;  %v2025_v13 = vpop.f32.mrb[36].mxu0  ;;  %2084 = vmatprep.subr.bf16.mxu1 %v2575_v54  ;;  %v1169_v54 = vld [vmem:[%s2452_s13 + $0x18] sm:$0xff]  ;;  %v1355_v8 = vlaneseq (!%p1857_p10) }
 0x155   : > { %v998_v18 = vadd.f32 %v2025_v13, %v2535_v46  ;;  %v989_v15 = vpop.f32.mrb[37].mxu0 }
 0x156   : > { %v990_v19 = vadd.f32 %v2535_v46, %v989_v15  ;;  %v2026_v24 = vpop.f32.mrb[38].mxu0  ;;  %1239 = vmatmul.mubr.f32.vlgmr.msra.gmra.mrb[20].mxu1 %v1166_v11  ;;  %v1356_v9 = vand.u32 (!%p1857_p10), 127, %v1355_v8 }
 0x157   : > { %v1138_v26 = vmax.f32 %v998_v18, 0.0  ;;  %v1001_v27 = vadd.f32 %v2026_v24, %v2535_v46  ;;  %2086 = vmatpush3.bf16.msra.mxu1 %v2085_v12  ;;  %v992_v16 = vpop.f32.mrb[39].mxu0  ;;  %1243 = vmatprep.mubr.f32.mxu1 %v1171_v14  ;;  %v2335_v24 = vmov (!%p1857_p10), 0  }
 0x158   : > { %v993_v29 = vadd.f32 %v2535_v46, %v992_v16  ;;  %2088 = vmatprep.subr.bf16.mxu1 %v2571_v51  ;;  %v1136_v32 = vmax.f32 %v990_v19, 0.0  ;;  %2216 = vset.pattern.permute.xlu0 (!%p1857_p10), %v2335_v24 }
 0x159   : > { %v1139_v31 = vmax.f32 %v1001_v27, 0.0  ;;  %2215 = vset.pattern.permute.xlu1 (!%p1857_p10), %v2335_v24 }
 0x15a   : > { %v1137_v33 = vmax.f32 %v993_v29, 0.0  ;;  %1244 = vmatmul.mubr.f32.gmra.mrb[22].mxu1 %v1170_v28 }
 0x15b   : > { %v2097_v34 = vpack.c.bf16 %v1139_v31, %v1138_v26  ;;  %2090 = vmatpush3.bf16.msra.mxu1 %v2089_v10  ;;  %1313 = vmatprep.mubr.f32.mxu1 %v1169_v54  ;;  %v1358_v10 = vshrl.u32 (!%p1857_p10), %v1355_v8, 7 }
 0x15c   : > { %v2093_v35 = vpack.c.bf16 %v1137_v33, %v1136_v32  ;;  %v2029_v36 = vpop.f32.mrb[40].mxu0  ;;  %2092 = vmatprep.subr.bf16.mxu1 %v2591_v20 }
 0x15d   : > { %v1014_v59 = vadd.f32 %v2029_v36, %v2535_v46  ;;  %v1005_v37 = vpop.f32.mrb[41].mxu0  ;;  %v2676_v12 = vsub.s32 (!%p1857_p10), %v1356_v9, %v1358_v10  ;;  %v2682_v26 = vsub.s32 (!%p1857_p10), 0, %v1358_v10  ;;  %v2684_v27 = vsub.s32 (!%p1857_p10), 1, %v1358_v10 }
 0x15e   : > { %v1006_v38 = vadd.f32 %v2535_v46, %v1005_v37  ;;  %v2030_v39 = vpop.f32.mrb[42].mxu0  ;;  %v1859_v37 = vld [vmem:[%s2839_s5] ss:$0 sm:$0xff] (!%p1857_p10) }
 0x15f   : > { %v1142_v40 = vmax.f32 %v1014_v59, 0.0  ;;  %v1017_v51 = vadd.f32 %v2030_v39, %v2535_v46  ;;  %2094 = vmatpush3.bf16.msra.mxu1 %v2093_v35  ;;  %v1008_v41 = vpop.f32.mrb[43].mxu0 }
 0x160   : > { %v1009_v42 = vadd.f32 %v2535_v46, %v1008_v41  ;;  %2096 = vmatprep.subr.bf16.mxu1 %v2587_v17  ;;  %v1140_v44 = vmax.f32 %v1006_v38, 0.0  ;;  %v1168_v46 = vld [vmem:[%s2452_s13 + $0x10] sm:$0xff]  ;;  %v1173_v17 = vld [vmem:[%s2452_s13 + $0x38] sm:$0xff]  ;;  %s1548_s13 = sld [smem:[#allocation3]] (!%p1857_p10) }
 0x161   : > { %v1143_v43 = vmax.f32 %v1017_v51, 0.0 }
 0x162   : > { %v1141_v20 = vmax.f32 %v1009_v42, 0.0 }
 0x163   : > { %v2105_v45 = vpack.c.bf16 %v1143_v43, %v1142_v40  ;;  %2098 = vmatpush3.bf16.msra.mxu1 %v2097_v34 }
 0x164   : > { %v2101_v47 = vpack.c.bf16 %v1141_v20, %v1140_v44  ;;  %2100 = vmatprep.subr.bf16.mxu1 %v2603_v57 }
 0x167   : > { %2102 = vmatpush3.bf16.msra.mxu1 %v2101_v47 }
 0x168   : > { %2104 = vmatprep.subr.bf16.mxu1 %v2601_v53 }
 0x16b   : > { %2106 = vmatpush3.bf16.msra.mxu1 %v2105_v45 }
 0x16c   : > { %2108 = vmatprep.subr.bf16.mxu1 %v2617_v30 }
 0x16f   : > { %2110 = vmatpush3.bf16.msra.mxu1 %v2559_v25  ;;  %v1164_v25 = vld [vmem:[#allocation2] sm:$0xff] }
 0x170   : > { %2112 = vmatprep.subr.bf16.mxu1 %v2615_v60 }
 0x173   : > { %2114 = vmatpush3.bf16.msra.mxu1 %v2555_v22 }
 0x176   : > { %1314 = vmatmul.mubr.f32.vlgmr.msra.gmra.mrb[24].mxu1 %v1168_v46 }
 0x177   : > { %1318 = vmatprep.mubr.f32.mxu1 %v1173_v17 }
 0x17a   : > { %1319 = vmatmul.mubr.f32.gmra.mrb[26].mxu1 %v1172_v48 }
 0x229   : > { %v1937_v23 = vpop.f32.mrb[20].mxu1 }
 0x22a   : > { %v1938_v57 = vpop.f32.mrb[21].mxu1 }
 0x22b   : > { %v1939_v49 = vadd.f32 %v1938_v57, %v1937_v23 }
 0x22d   : > { %v1940_v55 = vpop.f32.mrb[22].mxu1 }
 0x22e   : > { %v1941_v53 = vpop.f32.mrb[23].mxu1 }
 0x22f   : > { %v1942_v56 = vadd.f32 %v1941_v53, %v1940_v55 }
 0x249   : > { %v1975_v58 = vpop.f32.mrb[24].mxu1 }
 0x24a   : > { %v1976_v30 = vpop.f32.mrb[25].mxu1 }
 0x24b   : > { %v1977_v21 = vadd.f32 %v1976_v30, %v1975_v58 }
 0x24d   : > { %v1316_v61 = vadd.f32 %v1977_v21, %v1939_v49  ;;  %v1978_v60 = vpop.f32.mrb[26].mxu1 }
 0x24e   : > { %v1979_v62 = vpop.f32.mrb[27].mxu1 }
 0x24f   : > { %v1324_v22 = vadd.f32 %v1316_v61, %v1164_v25  ;;  %v1980_v63 = vadd.f32 %v1979_v62, %v1978_v60  ;;  %1331 = sbr.rel (%p1857_p10) target bundleno = 2070 (0x816), region = 87 }
 0x251   : > { %1326 = vst [vmem:[#allocation2] sm:$0xff] %v1324_v22  ;;  %v1321_v1 = vadd.f32 %v1980_v63, %v1942_v56 }
 0x253   : > { %v1325_v2 = vadd.f32 %v1321_v1, %v1165_v0 }
 0x255   : > { %1327 = vst [vmem:[#allocation2 + $0x8] sm:$0xff] %v1325_v2 }
 0x258   : > { %v1332_v59 = vld [vmem:[#allocation2] sm:$0xff] }
 0x259   : > { %v1526_v41 = vmul.f32 %v1859_v37, %v1332_v59 }
 0x25b   : > { %v1527_v45 = vsel %vm807_vm1, %v1526_v41, 0.0 }
 0x25c   : > { %v2663_v3 = vld [vmem:[#allocation2 + $0x8] sm:$0xff] }
 0x25d   : > { %v1344_v4 = vmul.f32 %v1858_v52, %v2663_v3  ;;  %v2671_v5 = vcombine.high %v2663_v3, %v2663_v3 }
 0x25f   : > { %v1347_v6 = vsel %vm1346_vm2, %v1344_v4, 0.0  ;;  %v1345_v7 = vmul.f32 %v1858_v52, %v2671_v5 }
 0x260   : > { %1348 = vadd.xlane.f32.xlu0 %v1347_v6 }
 0x261   : > { %v1350_v50 = vsel %vm1346_vm2, %v1345_v7, 0.0 }
 0x264   : > { %1351 = vadd.xlane.f32.xlu0 %v1350_v50 }
 0x2ed   : > { %v1349_v11 = vpop.xlane.xlu0 %1348 }
 0x2ee   : > { %v1360_v14 = vrot.slane %v1349_v11, %v2676_v12  ;;  %v1424_v42 = vmul.f32 10.0, %v1349_v11 }
 0x2f0   : > { %v1431_v47 = vrot.slane %v1424_v42, %v2676_v12 }
 0x2f1   : > { %v1352_v13 = vpop.xlane.xlu0 %1351 }
 0x2f2   : > { %v1364_v18 = vrot.slane %v1352_v13, %v2676_v12  ;;  %v1425_v40 = vmul.f32 10.0, %v1352_v13 }
 0x2f4   : > { %v1366_v15 = vsel %vm1365_vm3, %v1364_v18, %v1360_v14  ;;  %v1435_v20 = vrot.slane %v1425_v40, %v2676_v12 }
 0x2f5   : > { %v1369_v19 = vsel %vm1368_vm4, %v1366_v15, -inf }
 0x2f6   : > { %1370 = vmax.xlane.f32.xlu1 %v1369_v19  ;;  %v1436_v46 = vsel %vm1365_vm3, %v1435_v20, %v1431_v47 }
 0x2f7   : > { %v1438_v17 = vsel %vm1368_vm4, %v1436_v46, -inf }
 0x383   : > { %v1371_v16 = vpop.xlane.xlu1 %1370 }
 0x384   : > { %v1376_v28 = vrot.slane %v1371_v16, %v2682_v26  ;;  %v1380_v29 = vrot.slane %v1371_v16, %v2684_v27 }
 0x386   : > { %v1383_v54 = vsub.f32 %v1349_v11, %v1376_v28  ;;  %v1384_v31 = vsub.f32 %v1352_v13, %v1380_v29 }
 0x388   : > { %v1385_v32 = vmul.f32 1.442695, %v1383_v54  ;;  %v1387_v33 = vmul.f32 1.442695, %v1384_v31 }
 0x38a   : > { %2218 = vpow2.f32 %v1385_v32 }
 0x38b   : > { %2220 = vpow2.f32 %v1387_v33 }
 0x394   : > { %v2219_v34 = vpop.eup %2218 }
 0x395   : > { %v2221_v35 = vpop.eup %2220  ;;  %1392 = vperm.xlu1 %2215, %v2219_v34  }
 0x396   : > { %1395 = vperm.xlu0 %2216, %v2221_v35  }
 0x414   : > { %v1393_v36 = vpop.permute.xlu1 %1392 }
 0x415   : > { %v1396_v38 = vpop.permute.xlu0 %1395  ;;  %v1400_v39 = vrot.slane %v1393_v36, %v2676_v12 }
 0x416   : > { %v1404_v51 = vrot.slane %v1396_v38, %v2676_v12 }
 0x418   : > { %v1405_v43 = vsel %vm1365_vm3, %v1404_v51, %v1400_v39  ;;  %v1549_v39 = vstv %s1548_s13 }
 0x419   : > { %v1407_v44 = vsel %vm1368_vm4, %v1405_v43, 0.0 }
 0x41a   : > { %1408 = vadd.xlane.f32.xlu1 %v1407_v44 }
 0x41e   : > { %1528 = vadd.xlane.f32.xlu1 %v1527_v45 }
 0x422   : > { %1439 = vmax.xlane.f32.xlu1 %v1438_v17 }
 0x4a7   : > { %v1409_v48 = vpop.xlane.xlu1 %1408 }
 0x4a8   : > { %2222 = vrcp.f32 %v1409_v48 }
 0x4ab   : > { %v1529_v23 = vpop.xlane.xlu1 %1528 }
 0x4af   : > { %v1440_v57 = vpop.xlane.xlu1 %1439 }
 0x4b0   : > { %v1445_v49 = vrot.slane %v1440_v57, %v2682_v26  ;;  %v1449_v55 = vrot.slane %v1440_v57, %v2684_v27 }
 0x4b2   : > { %v2223_v53 = vpop.eup %2222  ;;  %v1452_v56 = vsub.f32 %v1424_v42, %v1445_v49  ;;  %v1453_v58 = vsub.f32 %v1425_v40, %v1449_v55 }
 0x4b3   : > { %v1419_v30 = vrot.slane %v2223_v53, %v2684_v27  ;;  %v1415_v61 = vrot.slane %v2223_v53, %v2682_v26 }
 0x4b4   : > { %v1454_v21 = vmul.f32 1.442695, %v1452_v56  ;;  %v1456_v60 = vmul.f32 1.442695, %v1453_v58 }
 0x4b5   : > { %v2703_v25 = vmul.f32 %v2221_v35, %v1419_v30  ;;  %v2707_v62 = vmul.f32 %v2219_v34, %v1415_v61 }
 0x4b6   : > { %2224 = vpow2.f32 %v1454_v21 }
 0x4b7   : > { %1500 = vperm.xlu0 %2216, %v2703_v25   ;;  %2226 = vpow2.f32 %v1456_v60 }
 0x4bb   : > { %1495 = vperm.xlu0 %2216, %v2707_v62  }
 0x4c0   : > { %v2225_v22 = vpop.eup %2224 }
 0x4c1   : > { %1461 = vperm.xlu1 %2215, %v2225_v22   ;;  %v2227_v63 = vpop.eup %2226 }
 0x4c5   : > { %1464 = vperm.xlu1 %2215, %v2227_v63  }
 0x536   : > { %v1501_v0 = vpop.permute.xlu0 %1500 }
 0x537   : > { %v1504_v1 = vmul.f32 %v1501_v0, %v2671_v5  ;;  %v1656_v6 = vrot.slane %v1501_v0, %v2676_v12 }
 0x539   : > { %v1512_v2 = vsel %vm1346_vm2, %v1504_v1, 0.0 }
 0x53a   : > { %v1513_v52 = vrot.slane %v1512_v2, 4  ;;  %v1496_v4 = vpop.permute.xlu0 %1495 }
 0x53b   : > { %v1503_v7 = vmul.f32 %v1496_v4, %v2663_v3  ;;  %v1652_v50 = vrot.slane %v1496_v4, %v2676_v12  ;;  %v1860_v3 = vld [vmem:[%s2840_s6] ss:$0 sm:$0xff] }
 0x53c   : > { %v1514_v8 = vadd.f32 %v1513_v52, %v1512_v2 }
 0x53d   : > { %v1505_v9 = vsel %vm1346_vm2, %v1503_v7, 0.0  ;;  %v1657_v10 = vsel %vm1365_vm3, %v1656_v6, %v1652_v50 }
 0x53e   : > { %v1515_v11 = vrot.slane %v1514_v8, 2  ;;  %v1506_v13 = vrot.slane %v1505_v9, 4  ;;  %1659 = vst.msk [vmem:[#allocation8] sm:$0x3] %vm1368_vm4, %v1657_v10 }
 0x540   : > { %v1516_v5 = vadd.f32 %v1515_v11, %v1514_v8  ;;  %v1507_v14 = vadd.f32 %v1506_v13, %v1505_v9  ;;  %v1462_v18 = vpop.permute.xlu1 %1461 }
 0x541   : > { %v1469_v35 = vrot.slane %v1462_v18, %v2676_v12 }
 0x542   : > { %v1517_v15 = vrot.slane %v1516_v5, 1  ;;  %v1508_v19 = vrot.slane %v1507_v14, 2 }
 0x544   : > { %v1509_v24 = vadd.f32 %v1508_v19, %v1507_v14  ;;  %v1518_v16 = vadd.f32 %v1517_v15, %v1516_v5  ;;  %v1465_v54 = vpop.permute.xlu1 %1464 }
 0x545   : > { %v1473_v32 = vrot.slane %v1465_v54, %v2676_v12 }
 0x546   : > { %v1510_v28 = vrot.slane %v1509_v24, 1  ;;  %v1538_v29 = vmul.f32 %v1860_v3, %v1518_v16 }
 0x547   : > { %v1474_v37 = vsel %vm1365_vm3, %v1473_v32, %v1469_v35 }
 0x548   : > { %v1511_v31 = vadd.f32 %v1510_v28, %v1509_v24  ;;  %v1541_v34 = vrot.slane %v1538_v29, 7  ;;  %v1476_v38 = vsel %vm1368_vm4, %v1474_v37, 0.0  ;;  %v1551_v24 = vld [vmem:[%s2842_s8] sm:$0x3] }
 0x54a   : > { %v1537_v33 = vmul.f32 %v1860_v3, %v1511_v31 }
 0x54c   : > { %v1542_v36 = vsel %vm1365_vm3, %v1541_v34, %v1537_v33 }
 0x54d   : > { %v1544_v59 = vsel %vm807_vm1, %v1542_v36, 0.0 }
 0x54e   : > { %1545 = vadd.xlane.f32.xlu0 %v1544_v59 }
 0x552   : > { %1477 = vadd.xlane.f32.xlu0 %v1476_v38 }
 0x5db   : > { %v1546_v40 = vpop.xlane.xlu0 %1545 }
 0x5dc   : > { %v1547_v51 = vadd.f32 %v1546_v40, %v1529_v23 }
 0x5de   : > { %v2727_v41 = vadd.f32 %v1549_v39, %v1547_v51 }
 0x5df   : > { %v1478_v42 = vpop.xlane.xlu0 %1477 }
 0x5e0   : > { %2228 = vrcp.f32 %v1478_v42  ;;  %v1552_v43 = vsel %vm807_vm1, %v2727_v41, -inf  ;;  %1629 = vst.msk [vmem:[%s2843_s9] sm:$0x3] %vm1564_vm5, %v2727_v41 }
 0x5e1   : > { %v1553_v44 = vrot.slane %v1552_v43, 4 }
 0x5e3   : > { %v1554_v20 = vmax.f32 %v1552_v43, %v1553_v44 }
 0x5e5   : > { %v1555_v45 = vrot.slane %v1554_v20, 2 }
 0x5e7   : > { %v1556_v47 = vmax.f32 %v1554_v20, %v1555_v45 }
 0x5e9   : > { %v1557_v46 = vrot.slane %v1556_v47, 1 }
 0x5ea   : > { %v2229_v17 = vpop.eup %2228 }
 0x5eb   : > { %v1558_v48 = vmax.f32 %v1556_v47, %v1557_v46  ;;  %v1484_v23 = vrot.slane %v2229_v17, %v2682_v26  ;;  %v1488_v57 = vrot.slane %v2229_v17, %v2684_v27 }
 0x5ed   : > { %2123 = vpush %v1558_v48  ;;  %v1491_v49 = vmul.f32 %v2225_v22, %v1484_v23  ;;  %v1492_v55 = vmul.f32 %v2227_v63, %v1488_v57 }
 0x5ef   : > { %v1594_v53 = vsub.f32 %v1491_v49, %v2707_v62  ;;  %v1595_v58 = vsub.f32 %v1492_v55, %v2703_v25 }
 0x5f1   : > { %v1596_v56 = vmul.f32 %v1594_v53, %v1594_v53  ;;  %v1597_v30 = vmul.f32 %v1595_v58, %v1595_v58 }
 0x5f3   : > { %1601 = vperm.xlu0 %2216, %v1596_v56  }
 0x5f7   : > { %1604 = vperm.xlu0 %2216, %v1597_v30  }
 0x61e   : > { %s2740_s14 = spop %2123 }
 0x61f   : > { %v1560_v21 = vstv %s2740_s14 }
 0x620   : > { %v1561_v61 = vsub.f32 %v2727_v41, %v1560_v21 }
 0x622   : > { %v1562_v26 = vmul.f32 1.442695, %v1561_v61 }
 0x624   : > { %2230 = vpow2.f32 %v1562_v26 }
 0x62e   : > { %v2231_v27 = vpop.eup %2230 }
 0x62f   : > { %v1565_v60 = vsel %vm1564_vm5, %v2231_v27, 0.0 }
 0x630   : > { %1566 = vadd.xlane.f32.xlu1 %v1565_v60 }
 0x672   : > { %v1602_v22 = vpop.permute.xlu0 %1601 }
 0x673   : > { %v1609_v63 = vrot.slane %v1602_v22, %v2676_v12 }
 0x676   : > { %v1605_v62 = vpop.permute.xlu0 %1604 }
 0x677   : > { %v1613_v25 = vrot.slane %v1605_v62, %v2676_v12 }
 0x679   : > { %v1614_v0 = vsel %vm1365_vm3, %v1613_v25, %v1609_v63 }
 0x67a   : > { %v1616_v1 = vsel %vm1368_vm4, %v1614_v0, 0.0 }
 0x67b   : > { %1617 = vadd.xlane.f32.xlu1 %v1616_v1 }
 0x68c   : > { %1633 = vperm.xlu1 %2215, %v1491_v49  }
 0x690   : > { %1636 = vperm.xlu1 %2215, %v1492_v55  }
 0x6bd   : > { %v1567_v2 = vpop.xlane.xlu1 %1566 }
 0x6be   : > { %v1568_v52 = vrot.slane %v1567_v2, 4 }
 0x6c0   : > { %v1569_v4 = vadd.f32 %v1568_v52, %v1567_v2 }
 0x6c2   : > { %v1570_v6 = vrot.slane %v1569_v4, 2 }
 0x6c4   : > { %v1571_v7 = vadd.f32 %v1570_v6, %v1569_v4 }
 0x6c6   : > { %v1572_v50 = vrot.slane %v1571_v7, 1 }
 0x6c8   : > { %v1573_v8 = vadd.f32 %v1572_v50, %v1571_v7 }
 0x6ca   : > { %2125 = vpush %v1573_v8 }
 0x6fb   : > { %s2126_s15 = spop %2125 }
 0x6fc   : > { %v1575_v9 = vstv %s2126_s15 }
 0x6fd   : > { %2232 = vlog2.f32 %v1575_v9 }
 0x707   : > { %v2233_v10 = vpop.eup %2232 }
 0x708   : > { %v1618_v11 = vpop.xlane.xlu1 %1617  ;;  %v1577_v13 = vmul.f32 0.6931472, %v2233_v10 }
 0x709   : > { %v1619_v54 = vrot.slane %v1618_v11, 4 }
 0x70a   : > { %2127 = vpush %v1577_v13 }
 0x70b   : > { %v1620_v31 = vadd.f32 %v1619_v54, %v1618_v11 }
 0x70c   : > { %v1634_v5 = vpop.permute.xlu1 %1633 }
 0x70d   : > { %v1641_v18 = vrot.slane %v1634_v5, %v2676_v12 }
 0x710   : > { %v1637_v14 = vpop.permute.xlu1 %1636 }
 0x711   : > { %v1645_v15 = vrot.slane %v1637_v14, %v2676_v12  ;;  %v1621_v12 = vrot.slane %v1620_v31, 2 }
 0x713   : > { %v1646_v19 = vsel %vm1365_vm3, %v1645_v15, %v1641_v18  ;;  %v1622_v35 = vadd.f32 %v1621_v12, %v1620_v31 }
 0x714   : > { %1648 = vst.msk [vmem:[#allocation5] sm:$0x3] %vm1368_vm4, %v1646_v19 }
 0x715   : > { %v1623_v37 = vrot.slane %v1622_v35, 1 }
 0x717   : > { %v1624_v40 = vadd.f32 %v1623_v37, %v1622_v35 }
 0x73b   : > { %s2128_s16 = spop %2127 }
 0x73c   : > { %s1579_s17 = sadd.f32 %s2128_s16, %s2740_s14 }
 0x73e   : > { %v1580_v3 = vstv %s1579_s17 }
 0x73f   : > { %v1581_v16 = vsub.f32 %v2727_v41, %v1580_v3 }
 0x741   : > { %v1582_v28 = vmul.f32 %v1581_v16, %v1551_v24 }
 0x743   : > { %v1583_v29 = vsel %vm1564_vm5, %v1582_v28, 0.0 }
 0x744   : > { %1584 = vadd.xlane.f32.xlu0 %v1583_v29 }
 0x7d1   : > { %v1585_v32 = vpop.xlane.xlu0 %1584 }
 0x7d2   : > { %v1586_v33 = vrot.slane %v1585_v32, 4 }
 0x7d4   : > { %v1587_v34 = vadd.f32 %v1586_v33, %v1585_v32 }
 0x7d6   : > { %v1588_v36 = vrot.slane %v1587_v34, 2 }
 0x7d8   : > { %v1589_v59 = vadd.f32 %v1588_v36, %v1587_v34 }
 0x7da   : > { %v1590_v38 = vrot.slane %v1589_v59, 1 }
 0x7dc   : > { %v1591_v39 = vadd.f32 %v1590_v38, %v1589_v59 }
 0x7de   : > { %2129 = vpush %v1591_v39 }
 0x7df   : > { %2131 = vpush %v1624_v40 }
 0x80f   : > { %s2130_s20 = spop %2129 }
 0x810   : > { %s1593_s21 = ssub.f32 0.0, %s2130_s20  ;;  %s2132_s22 = spop %2131 }
 0x811   : > { %s1628_s27 = smul.f32 0.125, %s2132_s22 }
 0x813   : > { %s1660_s28 = sadd.f32 %s1628_s27, %s1593_s21 }
 0x815   : > { %1662 = sst [smem:[#allocation10]] %s1660_s28 }
 0x816 PF: > { %p2145_p11 = scmp.eq.s32.totalorder %s2423_s7, 1  ;;  %s2336_s30 = smov [#allocation5]  }
 0x817   : > { %s1673_s13 = sshll.u32 %s2336_s30, 4  ;;  %s2337_s23 = smov [#allocation8]   ;;  %s1674_s13 = int_to_ptr.vmem [resolvable:$true] %s1673_s13 }
 0x818   : > { %s1684_s25 = sshll.u32 %s2337_s23, 4  ;;  %s2234_s14 = scalar_lea.vmem %s1674_s13, 32  ;;  %s1685_s25 = int_to_ptr.vmem [resolvable:$true] %s1684_s25 }
 0x819   : > { %p2235_p12 = scmp.ne.s32.totalorder %s1674_s13, %s2234_s14  ;;  %p2241_p1 = scmp.lt.s32.totalorder %s1674_s13, %s1674_s13 }
 0x81a   : > { %p2242_p2 = scmp.lt.s32.totalorder %s2234_s14, %s2234_s14 }
 0x81b   : > { %p2236_p13 = pnand %p2235_p12, %p2145_p11 }
 0x81c   : > { %p2243_p3 = por %p2242_p2, %p2241_p1 }
 0x81d   : > { %p2237_p0 = pneg %p2236_p13 }
 0x81f   : > { %p2244_p4 = pnand %p2243_p3, %p2237_p0 }
 0x821   : > { %2247 = shalt.err (!%p2244_p4)
}
 0x822   : > { %s2248_s17 = scalar_lea.hbm %s2844_s10, 32 }
 0x823   : > { %p2249_p5 = scmp.ne.s32.totalorder %s2844_s10, %s2248_s17  ;;  %p2254_p8 = scmp.lt.u32.totalorder %s2248_s17, %s2844_s10 }
 0x825   : > { %p2250_p6 = pnand %p2249_p5, %p2145_p11 }
 0x827   : > { %p2251_p7 = pneg %p2250_p6 }
 0x829   : > { %p2256_p9 = pnand %p2254_p8, %p2251_p7 }
 0x82b   : > { %2259 = shalt.err (!%p2256_p9)
}
 0x82c   : > { %2134 = dma.vmem_to_hbm [thread:$0]  (%p2145_p11), %s1674_s13, 32, %s2844_s10, [#allocation6]  }
 0x82d   : > { %s2260_s28 = scalar_lea.vmem %s1685_s25, 32  ;;  %p2267_p0 = scmp.lt.s32.totalorder %s1685_s25, %s1685_s25 }
 0x82e   : > { %p2261_p10 = scmp.ne.s32.totalorder %s1685_s25, %s2260_s28  ;;  %p2268_p1 = scmp.lt.s32.totalorder %s2260_s28, %s2260_s28 }
 0x830   : > { %p2262_p12 = pnand %p2261_p10, %p2145_p11  ;;  %p2269_p2 = por %p2268_p1, %p2267_p0 }
 0x832   : > { %p2263_p13 = pneg %p2262_p12 }
 0x834   : > { %p2270_p3 = pnand %p2269_p2, %p2263_p13 }
 0x836   : > { %2273 = shalt.err (!%p2270_p3)
}
 0x837   : > { %s2274_s14 = scalar_lea.hbm %s2845_s11, 32 }
 0x838   : > { %p2275_p4 = scmp.ne.s32.totalorder %s2845_s11, %s2274_s14  ;;  %p2280_p7 = scmp.lt.u32.totalorder %s2274_s14, %s2845_s11 }
 0x83a   : > { %p2276_p5 = pnand %p2275_p4, %p2145_p11 }
 0x83c   : > { %p2277_p6 = pneg %p2276_p5 }
 0x83e   : > { %p2282_p8 = pnand %p2280_p7, %p2277_p6 }
 0x840   : > { %2285 = shalt.err (!%p2282_p8)
}
 0x841   : > { %2136 = dma.vmem_to_hbm [thread:$0]  (%p2145_p11), %s1685_s25, 32, %s2845_s11, [#allocation9]  }
 0x842   : > { %s2286_s22 = scalar_lea.hbm %s2846_s12, 16 }
 0x843   : > { %p2287_p9 = scmp.ne.s32.totalorder %s2846_s12, %s2286_s22  ;;  %p2292_p13 = scmp.lt.u32.totalorder %s2286_s22, %s2846_s12 }
 0x845   : > { %p2288_p10 = pnand %p2287_p9, %p2145_p11 }
 0x847   : > { %p2289_p12 = pneg %p2288_p10 }
 0x849   : > { %p2294_p0 = pnand %p2292_p13, %p2289_p12 }
 0x84b   : > { %2297 = shalt.err (!%p2294_p0)
}
 0x84c   : > { %s2338_s14 = smov [#allocation10]  }
 0x84d   : > { %2138 = dma.smem_to_hbm (%p2145_p11), %s2338_s14, 16, %s2846_s12, [#allocation7]  }
 0x84e   : > { %2311 = dma.done.wait (%p2145_p11), [#allocation6], 32  }
 0x84f   : > { %2313 = vsyncadd (%p2145_p11), [#allocation6], 4294967264 }
 0x850   : > { %2315 = dma.done.wait (%p2145_p11), [#allocation9], 32  }
 0x851   : > { %2317 = vsyncadd (%p2145_p11), [#allocation9], 4294967264 }
 0x852   : > { %2319 = dma.done.wait (%p2145_p11), [#allocation7], 16  }
 0x853   : > { %2321 = vsyncadd (%p2145_p11), [#allocation7], 4294967280 }
 0x854   : > { %1712 = sfence }
 0x855 PF: > { %p24_p1 = scmp.ge.s32.totalorder %s2426_s26, 4   ;;  %s2847_s23 = smov %s2328_s24 }
 0x856   : > { %s2848_s24 = smov %s2435_s29  ;;  %s2849_s25 = smov %s2426_s26 }
 0x857   :  { %26 = sbr.rel (!%p24_p1) target bundleno = 6 (0x6), region = 148 }
 0x85e   :  { %1718 = vsyncpa [#allocation6], 1 }
 0x85f   :  { %1720 = vsyncpa [#allocation6 + $0x1], 1 }
 0x860   :  { %1721 = vsyncpa [#allocation9], 1 }
 0x861   :  { %1722 = vsyncpa [#allocation7], 1 }
 0x862   :  { %1724 = vsyncpa [#allocation7 + $0x1], 1 }

</bundles_post_ra>
